<compile_context>
chip_gen: v7x
topology: tpu7x:2x2x1
jax: 0.10.0
libtpu: 0.0.40
codegen_flags: <defaults>
</compile_context>

<pallas_src>
import jax
import jax.numpy as jnp
from jax import lax
from jax.experimental import pallas as pl
from jax.experimental.pallas import tpu as pltpu

_EPS = 1e-5                              # PyTorch BatchNorm1d default eps
_MAX_ROW_TILE = 2048                     # big tiles amortize per-grid-step overhead
_VMEM_LIMIT_BYTES = 32 * 1024 * 1024     # safe on v5e / v6e / v7x


def _round_up(n, m):
    return (n + m - 1) // m * m


def _row_tile(n_rows):
    # >= 2 grid steps whenever possible so both v7x TensorCores get work
    # (dimension_semantics=("parallel",) only helps when grid >= num_cores).
    half = _round_up((n_rows + 1) // 2, 8)
    return max(8, min(_MAX_ROW_TILE, half))


def _mm(x_bf16, w_ref):
    # MXU matmul: bf16 operands (weights pre-cast at prep time), f32 accumulate.
    return jnp.dot(x_bf16, w_ref[...], preferred_element_type=jnp.float32)


def _fma_cols(acc, einp, w_ref):
    # K = n_edge_inputs (== 1) contraction as VPU broadcast FMAs, not MXU pushes.
    w = w_ref[...]
    for k in range(einp.shape[1]):       # static unroll, NEI is tiny
        acc = acc + einp[:, k:k + 1] * w[k:k + 1, :]
    return acc


# ----------------------------------------------------------------------------
# Kernel 1: message MLP (BN folded).  First layer = one K=2*NF dot on the
# fused [src|dst] stream + a VPU FMA for the edge-input column.
# ----------------------------------------------------------------------------
def _msg_kernel(sd_ref, einp_ref, w_sd, w_e, b1, w2, b2, w3, b3, o_ref):
    sd = sd_ref[...].astype(jnp.bfloat16)
    h = _fma_cols(_mm(sd, w_sd), einp_ref[...], w_e) + b1[...]
    h = jnp.maximum(h, 0.0)
    h = jnp.maximum(_mm(h.astype(jnp.bfloat16), w2) + b2[...], 0.0)
    o_ref[...] = _mm(h.astype(jnp.bfloat16), w3) + b3[...]


# ----------------------------------------------------------------------------
# Kernel 2: node GRU cell, per-gate weights (PyTorch gate order r, z, n).
# The static input term ci_g = node_inputs @ W_ih_x_g + b_ih_g is precomputed
# once outside the iteration loop and streamed in.
# ----------------------------------------------------------------------------
def _node_gru_kernel(agg_ref, h_ref, ci_r, ci_z, ci_n,
                     wm_r, wm_z, wm_n, wh_r, wh_z, wh_n,
                     bhh_r, bhh_z, bhh_n, o_ref):
    agg = agg_ref[...].astype(jnp.bfloat16)
    h_f = h_ref[...]
    h_b = h_f.astype(jnp.bfloat16)
    r = jax.nn.sigmoid(_mm(agg, wm_r) + ci_r[...] + _mm(h_b, wh_r) + bhh_r[...])
    z = jax.nn.sigmoid(_mm(agg, wm_z) + ci_z[...] + _mm(h_b, wh_z) + bhh_z[...])
    n = jnp.tanh(_mm(agg, wm_n) + ci_n[...]
                 + r * (_mm(h_b, wh_n) + bhh_n[...]))
    o_ref[...] = (1.0 - z) * n + z * h_f


# ----------------------------------------------------------------------------
# Kernel 3: fused edge GRU cell + 3-layer output head (BN folded).
# Single merged output slab: [ new edge state (NEF) | head output (NEO) ].
# ----------------------------------------------------------------------------
def _edge_kernel(sd_ref, einp_ref, hy_ref,
                 wsd_r, wsd_z, wsd_n, we_r, we_z, we_n,
                 bih_r, bih_z, bih_n,
                 wh_r, wh_z, wh_n, bhh_r, bhh_z, bhh_n,
                 w1, b1, w2, b2, w3, b3, o_ref):
    NEF = wh_r.shape[0]
    sd = sd_ref[...].astype(jnp.bfloat16)
    einp = einp_ref[...]
    h_f = hy_ref[:, :NEF]                       # previous edge state (stale head cols unread)
    h_b = h_f.astype(jnp.bfloat16)

    def gi(w_sd, w_e, b):
        return _fma_cols(_mm(sd, w_sd), einp, w_e) + b[...]

    def gh(w, b):
        return _mm(h_b, w) + b[...]

    r = jax.nn.sigmoid(gi(wsd_r, we_r, bih_r) + gh(wh_r, bhh_r))
    z = jax.nn.sigmoid(gi(wsd_z, we_z, bih_z) + gh(wh_z, bhh_z))
    n = jnp.tanh(gi(wsd_n, we_n, bih_n) + r * gh(wh_n, bhh_n))
    h_new = (1.0 - z) * n + z * h_f

    # output head on the fresh hidden state (gru_out[0] == h_new for seq_len=1)
    t = jnp.maximum(_mm(h_new.astype(jnp.bfloat16), w1) + b1[...], 0.0)
    t = jnp.maximum(_mm(t.astype(jnp.bfloat16), w2) + b2[...], 0.0)
    y = _mm(t.astype(jnp.bfloat16), w3) + b3[...]

    o_ref[:, :NEF] = h_new
    o_ref[:, NEF:] = y


# ----------------------------------------------------------------------------
# Row-tiled pallas_call wrapper: activations tiled over (pre-padded) rows,
# weights grid-resident (same (0,0) block every step).
# ----------------------------------------------------------------------------
def _row_call(kernel, acts, weights, out_dim, tile):
    n_pad = acts[0].shape[0]
    grid = (n_pad // tile,)
    act_specs = [pl.BlockSpec((tile, a.shape[1]), lambda i: (i, 0)) for a in acts]
    w_specs = [pl.BlockSpec(w.shape, lambda i: (0, 0)) for w in weights]
    return pl.pallas_call(
        kernel,
        grid=grid,
        in_specs=act_specs + w_specs,
        out_specs=pl.BlockSpec((tile, out_dim), lambda i: (i, 0)),
        out_shape=jax.ShapeDtypeStruct((n_pad, out_dim), jnp.float32),
        compiler_params=pltpu.CompilerParams(
            dimension_semantics=("parallel",),     # shard row tiles across TCs (v7x)
            vmem_limit_bytes=_VMEM_LIMIT_BYTES),
    )(*acts, *weights)


# ----------------------------------------------------------------------------
# Parameter init (PyTorch-like) + prep (BN fold, per-gate split, bf16 pre-cast)
# ----------------------------------------------------------------------------
def _init_linear(key, fan_in, fan_out):
    k1, k2 = jax.random.split(key)
    bound = 1.0 / (fan_in ** 0.5)
    w = jax.random.uniform(k1, (fan_in, fan_out), jnp.float32, -bound, bound)
    b = jax.random.uniform(k2, (1, fan_out), jnp.float32, -bound, bound)
    return w, b


def _init_bn(key, dim):
    k1, k2, k3, k4 = jax.random.split(key, 4)
    g = 1.0 + 0.1 * jax.random.normal(k1, (1, dim), jnp.float32)
    be = 0.1 * jax.random.normal(k2, (1, dim), jnp.float32)
    m = 0.1 * jax.random.normal(k3, (1, dim), jnp.float32)
    v = 1.0 + 0.1 * jnp.abs(jax.random.normal(k4, (1, dim), jnp.float32))
    return g, be, m, v


def _init_mlp3(key, d_in, h1, h2, d_out):
    keys = jax.random.split(key, 5)
    w1, b1 = _init_linear(keys[0], d_in, h1)
    g1, be1, m1, v1 = _init_bn(keys[1], h1)
    w2, b2 = _init_linear(keys[2], h1, h2)
    g2, be2, m2, v2 = _init_bn(keys[3], h2)
    w3, b3 = _init_linear(keys[4], h2, d_out)
    return dict(w1=w1, b1=b1, g1=g1, be1=be1, m1=m1, v1=v1,
                w2=w2, b2=b2, g2=g2, be2=be2, m2=m2, v2=v2,
                w3=w3, b3=b3)


def _init_gru(key, d_in, hidden):
    keys = jax.random.split(key, 4)
    bound = 1.0 / (hidden ** 0.5)
    wih = jax.random.uniform(keys[0], (d_in, 3 * hidden), jnp.float32, -bound, bound)
    whh = jax.random.uniform(keys[1], (hidden, 3 * hidden), jnp.float32, -bound, bound)
    bih = jax.random.uniform(keys[2], (1, 3 * hidden), jnp.float32, -bound, bound)
    bhh = jax.random.uniform(keys[3], (1, 3 * hidden), jnp.float32, -bound, bound)
    return dict(wih=wih, whh=whh, bih=bih, bhh=bhh)


def init_raw_params(key, cfg):
    NF, NEI = cfg["n_node_features"], cfg["n_edge_inputs"]
    NM, NNI = cfg["n_msg_features"], cfg["n_node_inputs"]
    NEF, NEO = cfg["n_edge_features"], cfg["n_edge_outputs"]
    h1m, h2m = cfg["hidden_dims_msg"]
    h1o, h2o = cfg["hidden_dims_output"]
    k = jax.random.split(key, 4)
    return dict(
        msg=_init_mlp3(k[0], 2 * NF + NEI, h1m, h2m, NM),
        gru_nodes=_init_gru(k[1], NM + NNI, NF),
        gru_edges=_init_gru(k[2], 2 * NF + NEI, NEF),
        out=_init_mlp3(k[3], NEF, h1o, h2o, NEO),
    )


def _fold_bn(w, b, g, beta, mean, var):
    scale = g / jnp.sqrt(var + _EPS)                 # f32 fold at prep time
    return w * scale, (b - mean) * scale + beta


def prepare_params(raw, cfg):
    NF, NM = cfg["n_node_features"], cfg["n_msg_features"]
    NEF = cfg["n_edge_features"]
    bf16 = jnp.bfloat16

    def fold_mlp3(p):
        w1, b1 = _fold_bn(p["w1"], p["b1"], p["g1"], p["be1"], p["m1"], p["v1"])
        w2, b2 = _fold_bn(p["w2"], p["b2"], p["g2"], p["be2"], p["m2"], p["v2"])
        return w1, b1, w2, b2, p["w3"], p["b3"]

    def split_gates(w, h):
        return [w[:, g * h:(g + 1) * h] for g in range(3)]   # r, z, n (PyTorch order)

    # message MLP: dense [src|dst] block -> bf16 MXU, edge-input row -> f32 VPU FMA
    w1, b1, w2, b2, w3, b3 = fold_mlp3(raw["msg"])
    msg = dict(w_sd=w1[:2 * NF].astype(bf16), w_e=w1[2 * NF:], b1=b1,
               w2=w2.astype(bf16), b2=b2, w3=w3.astype(bf16), b3=b3)

    # output head
    w1, b1, w2, b2, w3, b3 = fold_mlp3(raw["out"])
    out = dict(w1=w1.astype(bf16), b1=b1, w2=w2.astype(bf16), b2=b2,
               w3=w3.astype(bf16), b3=b3)

    # node GRU: split W_ih rows into msg / node-input parts, then per gate
    p = raw["gru_nodes"]
    gru_nodes = dict(
        wm=[w.astype(bf16) for w in split_gates(p["wih"][:NM], NF)],
        wx=split_gates(p["wih"][NM:], NF),            # f32, used once outside scan
        bih=split_gates(p["bih"], NF),
        whh=[w.astype(bf16) for w in split_gates(p["whh"], NF)],
        bhh=split_gates(p["bhh"], NF))

    # edge GRU: split W_ih rows into [src|dst] / edge-input parts, then per gate
    p = raw["gru_edges"]
    gru_edges = dict(
        wsd=[w.astype(bf16) for w in split_gates(p["wih"][:2 * NF], NEF)],
        we=split_gates(p["wih"][2 * NF:], NEF),       # f32, in-kernel VPU FMA
        bih=split_gates(p["bih"], NEF),
        whh=[w.astype(bf16) for w in split_gates(p["whh"], NEF)],
        bhh=split_gates(p["bhh"], NEF))

    return dict(msg=msg, out=out, gru_nodes=gru_nodes, gru_edges=gru_edges)


# ----------------------------------------------------------------------------
# Full forward pass (mirrors VRPNet.forward, eval mode)
# ----------------------------------------------------------------------------
def vrp_forward(params, cfg, node_inputs, edge_inputs, src_ids, dst_ids):
    B, Npb, NNI = node_inputs.shape
    n_nodes = B * Npb
    n_edges = edge_inputs.shape[0]
    NF, NEF = cfg["n_node_features"], cfg["n_edge_features"]
    NM, NEO = cfg["n_msg_features"], cfg["n_edge_outputs"]

    # row tiles and one-time padding (kept padded across the whole scan)
    tile_n = _row_tile(n_nodes)
    tile_e = _row_tile(n_edges)
    n_nodes_pad = _round_up(n_nodes, tile_n)
    n_edges_pad = _round_up(n_edges, tile_e)

    node_in_pad = jnp.pad(node_inputs.reshape(n_nodes, NNI),
                          ((0, n_nodes_pad - n_nodes), (0, 0)))
    edge_in_pad = jnp.pad(edge_inputs, ((0, n_edges_pad - n_edges), (0, 0)))
    sd_idx = jnp.pad(jnp.stack([src_ids, dst_ids], axis=1),
                     ((0, n_edges_pad - n_edges), (0, 0)))   # fused [src|dst] gather idx

    msg_p, out_p = params["msg"], params["out"]
    gn_p, ge_p = params["gru_nodes"], params["gru_edges"]

    # static node-GRU input contribution (node_inputs never change): hoisted out
    # of the iteration loop, one (rows, NF) stream per gate (lane-0 aligned).
    ci = [node_in_pad @ gn_p["wx"][g] + gn_p["bih"][g] for g in range(3)]

    node_states0 = jnp.zeros((n_nodes_pad, NF), jnp.float32)
    hy0 = jnp.zeros((n_edges_pad, NEF + NEO), jnp.float32)   # [edge_state | head out]

    # precomputed flat 1-D scatter index for the dense output tensor
    dst_cols = dst_ids % Npb
    flat_idx = src_ids * Npb + dst_cols
    base = jnp.zeros((n_nodes * Npb, NEO), jnp.float32)
    base = base.at[:, 0].set(1.0).at[:, 1].set(-10.0)

    def step(carry, _):
        node_states, hy = carry

        # ---- message pass (single fused [src|dst] gather, XLA glue) ----
        sd = jnp.take(node_states, sd_idx, axis=0).reshape(n_edges_pad, 2 * NF)
        msg = _row_call(
            _msg_kernel,
            [sd, edge_in_pad],
            [msg_p["w_sd"], msg_p["w_e"], msg_p["b1"], msg_p["w2"], msg_p["b2"],
             msg_p["w3"], msg_p["b3"]],
            NM, tile_e)

        # ---- aggregate messages per destination node (index_add_) ----
        agg = jnp.zeros((n_nodes_pad, NM), jnp.float32).at[dst_ids].add(msg[:n_edges])

        # ---- node GRU update ----
        node_states = _row_call(
            _node_gru_kernel,
            [agg, node_states, ci[0], ci[1], ci[2]],
            [*gn_p["wm"], *gn_p["whh"], *gn_p["bhh"]],
            NF, tile_n)

        # ---- fused edge GRU update + output head (one merged output slab) ----
        sd = jnp.take(node_states, sd_idx, axis=0).reshape(n_edges_pad, 2 * NF)
        hy = _row_call(
            _edge_kernel,
            [sd, edge_in_pad, hy],
            [*ge_p["wsd"], *ge_p["we"], *ge_p["bih"], *ge_p["whh"], *ge_p["bhh"],
             out_p["w1"], out_p["b1"], out_p["w2"], out_p["b2"],
             out_p["w3"], out_p["b3"]],
            NEF + NEO, tile_e)

        # ---- write iteration output (1-D scatter; last-write-wins on dup idx,
        #      same as PyTorch advanced-index assignment) ----
        iter_out = hy[:n_edges, NEF:]
        out_i = base.at[flat_idx].set(iter_out)
        return (node_states, hy), out_i

    (_, _), outs = lax.scan(step, (node_states0, hy0), None,
                            length=cfg["n_iters"])
    return outs.reshape(cfg["n_iters"], n_nodes, Npb, NEO)


if __name__ == "__main__":
    # module-default feature dims, small graph, short iteration count
    cfg = dict(n_iters=3, n_node_features=128, n_node_inputs=3,
               n_msg_features=10, n_edge_features=64, n_edge_inputs=1,
               n_edge_outputs=2, hidden_dims_msg=(96, 96),
               hidden_dims_output=(96, 96))

    key = jax.random.PRNGKey(0)
    k_p, k_x, k_e = jax.random.split(key, 3)

    params = prepare_params(init_raw_params(k_p, cfg), cfg)

    B, Npb = 2, 8
    node_inputs = jax.random.normal(k_x, (B, Npb, cfg["n_node_inputs"]),
                                    jnp.float32)

    # edges: each node connects to its next two nodes within its batch (cyclic)
    src_list, dst_list = [], []
    for b in range(B):
        for j in range(Npb):
            for off in (1, 2):
                src_list.append(b * Npb + j)
                dst_list.append(b * Npb + (j + off) % Npb)
    src_ids = jnp.array(src_list, dtype=jnp.int32)
    dst_ids = jnp.array(dst_list, dtype=jnp.int32)
    edge_inputs = jax.random.normal(k_e, (src_ids.shape[0], cfg["n_edge_inputs"]),
                                    jnp.float32)

    fwd = jax.jit(lambda p, ni, ei, si, di: vrp_forward(p, cfg, ni, ei, si, di))
    out = fwd(params, node_inputs, edge_inputs, src_ids, dst_ids)
    jax.block_until_ready(out)
    assert out.shape == (cfg["n_iters"], B * Npb, Npb, cfg["n_edge_outputs"])
    assert bool(jnp.all(jnp.isfinite(out)))
    print("KERNEL_OK")
</pallas_src>

<mosaic_0001>
module attributes {stable_mosaic.version = 11 : i64} {
  func.func @_node_gru_kernel(%arg0: i32, %arg1: memref<8x10xf32, #tpu.memory_space<vmem>>, %arg2: memref<8x128xf32, #tpu.memory_space<vmem>>, %arg3: memref<8x128xf32, #tpu.memory_space<vmem>>, %arg4: memref<8x128xf32, #tpu.memory_space<vmem>>, %arg5: memref<8x128xf32, #tpu.memory_space<vmem>>, %arg6: memref<10x128xbf16, #tpu.memory_space<vmem>>, %arg7: memref<10x128xbf16, #tpu.memory_space<vmem>>, %arg8: memref<10x128xbf16, #tpu.memory_space<vmem>>, %arg9: memref<128x128xbf16, #tpu.memory_space<vmem>>, %arg10: memref<128x128xbf16, #tpu.memory_space<vmem>>, %arg11: memref<128x128xbf16, #tpu.memory_space<vmem>>, %arg12: memref<1x128xf32, #tpu.memory_space<vmem>>, %arg13: memref<1x128xf32, #tpu.memory_space<vmem>>, %arg14: memref<1x128xf32, #tpu.memory_space<vmem>>, %arg15: memref<8x128xf32, #tpu.memory_space<vmem>>) attributes {dimension_semantics = [#tpu.dimension_semantics<parallel>], iteration_bounds = array<i64: 2>, scalar_prefetch = 0 : i64, scratch_operands = 0 : i64, tpu.core_type = #tpu.core_type<tc>, window_params = [{transform_indices = @transform_0, window_bounds = array<i64: 8, 10>}, {transform_indices = @transform_1, window_bounds = array<i64: 8, 128>}, {transform_indices = @transform_2, window_bounds = array<i64: 8, 128>}, {transform_indices = @transform_3, window_bounds = array<i64: 8, 128>}, {transform_indices = @transform_4, window_bounds = array<i64: 8, 128>}, {pipeline_mode = #tpu.pipeline_mode<synchronous>, transform_indices = @transform_5, window_bounds = array<i64: 10, 128>}, {pipeline_mode = #tpu.pipeline_mode<synchronous>, transform_indices = @transform_6, window_bounds = array<i64: 10, 128>}, {pipeline_mode = #tpu.pipeline_mode<synchronous>, transform_indices = @transform_7, window_bounds = array<i64: 10, 128>}, {pipeline_mode = #tpu.pipeline_mode<synchronous>, transform_indices = @transform_8, window_bounds = array<i64: 128, 128>}, {pipeline_mode = #tpu.pipeline_mode<synchronous>, transform_indices = @transform_9, window_bounds = array<i64: 128, 128>}, {pipeline_mode = #tpu.pipeline_mode<synchronous>, transform_indices = @transform_10, window_bounds = array<i64: 128, 128>}, {pipeline_mode = #tpu.pipeline_mode<synchronous>, transform_indices = @transform_11, window_bounds = array<i64: 1, 128>}, {pipeline_mode = #tpu.pipeline_mode<synchronous>, transform_indices = @transform_12, window_bounds = array<i64: 1, 128>}, {pipeline_mode = #tpu.pipeline_mode<synchronous>, transform_indices = @transform_13, window_bounds = array<i64: 1, 128>}, {transform_indices = @transform_14, window_bounds = array<i64: 8, 128>}]} {
    %c0 = arith.constant 0 : index
    %c0_0 = arith.constant 0 : index
    %0 = vector.load %arg1[%c0, %c0_0] : memref<8x10xf32, #tpu.memory_space<vmem>>, vector<8x10xf32>
    %1 = arith.truncf %0 : vector<8x10xf32> to vector<8x10xbf16>
    %c0_1 = arith.constant 0 : index
    %c0_2 = arith.constant 0 : index
    %2 = vector.load %arg2[%c0_1, %c0_2] : memref<8x128xf32, #tpu.memory_space<vmem>>, vector<8x128xf32>
    %3 = arith.truncf %2 : vector<8x128xf32> to vector<8x128xbf16>
    %c0_3 = arith.constant 0 : index
    %c0_4 = arith.constant 0 : index
    %4 = vector.load %arg6[%c0_3, %c0_4] : memref<10x128xbf16, #tpu.memory_space<vmem>>, vector<10x128xbf16>
    %cst = arith.constant dense<0.000000e+00> : vector<8x128xf32>
    %5 = tpu.matmul %1, %4, %cst {dimension_numbers = #tpu.dot_dimension_numbers<[1], [0], [0], [1], [0, 0, 1, 1], [], []>} : vector<8x10xbf16>, vector<10x128xbf16>, vector<8x128xf32> -> vector<8x128xf32>
    %c0_5 = arith.constant 0 : index
    %c0_6 = arith.constant 0 : index
    %6 = vector.load %arg3[%c0_5, %c0_6] : memref<8x128xf32, #tpu.memory_space<vmem>>, vector<8x128xf32>
    %7 = arith.addf %5, %6 : vector<8x128xf32>
    %c0_7 = arith.constant 0 : index
    %c0_8 = arith.constant 0 : index
    %8 = vector.load %arg9[%c0_7, %c0_8] : memref<128x128xbf16, #tpu.memory_space<vmem>>, vector<128x128xbf16>
    %cst_9 = arith.constant dense<0.000000e+00> : vector<8x128xf32>
    %9 = tpu.matmul %3, %8, %cst_9 {dimension_numbers = #tpu.dot_dimension_numbers<[1], [0], [0], [1], [0, 0, 1, 1], [], []>} : vector<8x128xbf16>, vector<128x128xbf16>, vector<8x128xf32> -> vector<8x128xf32>
    %10 = arith.addf %7, %9 : vector<8x128xf32>
    %c0_10 = arith.constant 0 : index
    %c0_11 = arith.constant 0 : index
    %11 = vector.load %arg12[%c0_10, %c0_11] : memref<1x128xf32, #tpu.memory_space<vmem>>, vector<1x128xf32>
    %12 = vector.broadcast %11 : vector<1x128xf32> to vector<8x128xf32>
    %13 = arith.addf %10, %12 : vector<8x128xf32>
    %14 = arith.negf %13 : vector<8x128xf32>
    %15 = math.exp %14 : vector<8x128xf32>
    %cst_12 = arith.constant 1.000000e+00 : f32
    %16 = vector.broadcast %cst_12 : f32 to vector<8x128xf32>
    %17 = arith.addf %16, %15 : vector<8x128xf32>
    %18 = arith.divf %16, %17 : vector<8x128xf32>
    %c0_13 = arith.constant 0 : index
    %c0_14 = arith.constant 0 : index
    %19 = vector.load %arg7[%c0_13, %c0_14] : memref<10x128xbf16, #tpu.memory_space<vmem>>, vector<10x128xbf16>
    %cst_15 = arith.constant dense<0.000000e+00> : vector<8x128xf32>
    %20 = tpu.matmul %1, %19, %cst_15 {dimension_numbers = #tpu.dot_dimension_numbers<[1], [0], [0], [1], [0, 0, 1, 1], [], []>} : vector<8x10xbf16>, vector<10x128xbf16>, vector<8x128xf32> -> vector<8x128xf32>
    %c0_16 = arith.constant 0 : index
    %c0_17 = arith.constant 0 : index
    %21 = vector.load %arg4[%c0_16, %c0_17] : memref<8x128xf32, #tpu.memory_space<vmem>>, vector<8x128xf32>
    %22 = arith.addf %20, %21 : vector<8x128xf32>
    %c0_18 = arith.constant 0 : index
    %c0_19 = arith.constant 0 : index
    %23 = vector.load %arg10[%c0_18, %c0_19] : memref<128x128xbf16, #tpu.memory_space<vmem>>, vector<128x128xbf16>
    %cst_20 = arith.constant dense<0.000000e+00> : vector<8x128xf32>
    %24 = tpu.matmul %3, %23, %cst_20 {dimension_numbers = #tpu.dot_dimension_numbers<[1], [0], [0], [1], [0, 0, 1, 1], [], []>} : vector<8x128xbf16>, vector<128x128xbf16>, vector<8x128xf32> -> vector<8x128xf32>
    %25 = arith.addf %22, %24 : vector<8x128xf32>
    %c0_21 = arith.constant 0 : index
    %c0_22 = arith.constant 0 : index
    %26 = vector.load %arg13[%c0_21, %c0_22] : memref<1x128xf32, #tpu.memory_space<vmem>>, vector<1x128xf32>
    %27 = vector.broadcast %26 : vector<1x128xf32> to vector<8x128xf32>
    %28 = arith.addf %25, %27 : vector<8x128xf32>
    %29 = arith.negf %28 : vector<8x128xf32>
    %30 = math.exp %29 : vector<8x128xf32>
    %cst_23 = arith.constant 1.000000e+00 : f32
    %31 = vector.broadcast %cst_23 : f32 to vector<8x128xf32>
    %32 = arith.addf %31, %30 : vector<8x128xf32>
    %33 = arith.divf %31, %32 : vector<8x128xf32>
    %c0_24 = arith.constant 0 : index
    %c0_25 = arith.constant 0 : index
    %34 = vector.load %arg8[%c0_24, %c0_25] : memref<10x128xbf16, #tpu.memory_space<vmem>>, vector<10x128xbf16>
    %cst_26 = arith.constant dense<0.000000e+00> : vector<8x128xf32>
    %35 = tpu.matmul %1, %34, %cst_26 {dimension_numbers = #tpu.dot_dimension_numbers<[1], [0], [0], [1], [0, 0, 1, 1], [], []>} : vector<8x10xbf16>, vector<10x128xbf16>, vector<8x128xf32> -> vector<8x128xf32>
    %c0_27 = arith.constant 0 : index
    %c0_28 = arith.constant 0 : index
    %36 = vector.load %arg5[%c0_27, %c0_28] : memref<8x128xf32, #tpu.memory_space<vmem>>, vector<8x128xf32>
    %37 = arith.addf %35, %36 : vector<8x128xf32>
    %c0_29 = arith.constant 0 : index
    %c0_30 = arith.constant 0 : index
    %38 = vector.load %arg11[%c0_29, %c0_30] : memref<128x128xbf16, #tpu.memory_space<vmem>>, vector<128x128xbf16>
    %cst_31 = arith.constant dense<0.000000e+00> : vector<8x128xf32>
    %39 = tpu.matmul %3, %38, %cst_31 {dimension_numbers = #tpu.dot_dimension_numbers<[1], [0], [0], [1], [0, 0, 1, 1], [], []>} : vector<8x128xbf16>, vector<128x128xbf16>, vector<8x128xf32> -> vector<8x128xf32>
    %c0_32 = arith.constant 0 : index
    %c0_33 = arith.constant 0 : index
    %40 = vector.load %arg14[%c0_32, %c0_33] : memref<1x128xf32, #tpu.memory_space<vmem>>, vector<1x128xf32>
    %41 = vector.broadcast %40 : vector<1x128xf32> to vector<8x128xf32>
    %42 = arith.addf %39, %41 : vector<8x128xf32>
    %43 = arith.mulf %18, %42 : vector<8x128xf32>
    %44 = arith.addf %37, %43 : vector<8x128xf32>
    %45 = math.tanh %44 : vector<8x128xf32>
    %cst_34 = arith.constant 1.000000e+00 : f32
    %46 = vector.broadcast %cst_34 : f32 to vector<8x128xf32>
    %47 = arith.subf %46, %33 : vector<8x128xf32>
    %48 = arith.mulf %47, %45 : vector<8x128xf32>
    %49 = arith.mulf %33, %2 : vector<8x128xf32>
    %50 = arith.addf %48, %49 : vector<8x128xf32>
    %c0_35 = arith.constant 0 : index
    %c0_36 = arith.constant 0 : index
    %51 = vector.load %arg15[%c0_35, %c0_36] : memref<8x128xf32, #tpu.memory_space<vmem>>, vector<8x128xf32>
    tpu.vector_store %arg15[%c0_35, %c0_36], %50 {strides = array<i32>} : memref<8x128xf32, #tpu.memory_space<vmem>>, vector<8x128xf32>,
    return
  }
  func.func @transform_0(%arg0: i32) -> (i32, i32) {
    %c0_i32 = arith.constant 0 : i32
    %c0_i32_0 = arith.constant 0 : i32
    return %arg0, %c0_i32 : i32, i32
  }
  func.func @transform_1(%arg0: i32) -> (i32, i32) {
    %c0_i32 = arith.constant 0 : i32
    %c0_i32_0 = arith.constant 0 : i32
    return %arg0, %c0_i32 : i32, i32
  }
  func.func @transform_2(%arg0: i32) -> (i32, i32) {
    %c0_i32 = arith.constant 0 : i32
    %c0_i32_0 = arith.constant 0 : i32
    return %arg0, %c0_i32 : i32, i32
  }
  func.func @transform_3(%arg0: i32) -> (i32, i32) {
    %c0_i32 = arith.constant 0 : i32
    %c0_i32_0 = arith.constant 0 : i32
    return %arg0, %c0_i32 : i32, i32
  }
  func.func @transform_4(%arg0: i32) -> (i32, i32) {
    %c0_i32 = arith.constant 0 : i32
    %c0_i32_0 = arith.constant 0 : i32
    return %arg0, %c0_i32 : i32, i32
  }
  func.func @transform_5(%arg0: i32) -> (i32, i32) {
    %c0_i32 = arith.constant 0 : i32
    %c0_i32_0 = arith.constant 0 : i32
    %c0_i32_1 = arith.constant 0 : i32
    return %c0_i32, %c0_i32_0 : i32, i32
  }
  func.func @transform_6(%arg0: i32) -> (i32, i32) {
    %c0_i32 = arith.constant 0 : i32
    %c0_i32_0 = arith.constant 0 : i32
    %c0_i32_1 = arith.constant 0 : i32
    return %c0_i32, %c0_i32_0 : i32, i32
  }
  func.func @transform_7(%arg0: i32) -> (i32, i32) {
    %c0_i32 = arith.constant 0 : i32
    %c0_i32_0 = arith.constant 0 : i32
    %c0_i32_1 = arith.constant 0 : i32
    return %c0_i32, %c0_i32_0 : i32, i32
  }
  func.func @transform_8(%arg0: i32) -> (i32, i32) {
    %c0_i32 = arith.constant 0 : i32
    %c0_i32_0 = arith.constant 0 : i32
    %c0_i32_1 = arith.constant 0 : i32
    return %c0_i32, %c0_i32_0 : i32, i32
  }
  func.func @transform_9(%arg0: i32) -> (i32, i32) {
    %c0_i32 = arith.constant 0 : i32
    %c0_i32_0 = arith.constant 0 : i32
    %c0_i32_1 = arith.constant 0 : i32
    return %c0_i32, %c0_i32_0 : i32, i32
  }
  func.func @transform_10(%arg0: i32) -> (i32, i32) {
    %c0_i32 = arith.constant 0 : i32
    %c0_i32_0 = arith.constant 0 : i32
    %c0_i32_1 = arith.constant 0 : i32
    return %c0_i32, %c0_i32_0 : i32, i32
  }
  func.func @transform_11(%arg0: i32) -> (i32, i32) {
    %c0_i32 = arith.constant 0 : i32
    %c0_i32_0 = arith.constant 0 : i32
    %c0_i32_1 = arith.constant 0 : i32
    return %c0_i32, %c0_i32_0 : i32, i32
  }
  func.func @transform_12(%arg0: i32) -> (i32, i32) {
    %c0_i32 = arith.constant 0 : i32
    %c0_i32_0 = arith.constant 0 : i32
    %c0_i32_1 = arith.constant 0 : i32
    return %c0_i32, %c0_i32_0 : i32, i32
  }
  func.func @transform_13(%arg0: i32) -> (i32, i32) {
    %c0_i32 = arith.constant 0 : i32
    %c0_i32_0 = arith.constant 0 : i32
    %c0_i32_1 = arith.constant 0 : i32
    return %c0_i32, %c0_i32_0 : i32, i32
  }
  func.func @transform_14(%arg0: i32) -> (i32, i32) {
    %c0_i32 = arith.constant 0 : i32
    %c0_i32_0 = arith.constant 0 : i32
    return %arg0, %c0_i32 : i32, i32
  }
}

module attributes {stable_mosaic.version = 11 : i64} {
  func.func @_msg_kernel(%arg0: i32, %arg1: memref<16x256xf32, #tpu.memory_space<vmem>>, %arg2: memref<16x1xf32, #tpu.memory_space<vmem>>, %arg3: memref<256x96xbf16, #tpu.memory_space<vmem>>, %arg4: memref<1x96xf32, #tpu.memory_space<vmem>>, %arg5: memref<1x96xf32, #tpu.memory_space<vmem>>, %arg6: memref<96x96xbf16, #tpu.memory_space<vmem>>, %arg7: memref<1x96xf32, #tpu.memory_space<vmem>>, %arg8: memref<96x10xbf16, #tpu.memory_space<vmem>>, %arg9: memref<1x10xf32, #tpu.memory_space<vmem>>, %arg10: memref<16x10xf32, #tpu.memory_space<vmem>>) attributes {dimension_semantics = [#tpu.dimension_semantics<parallel>], iteration_bounds = array<i64: 2>, scalar_prefetch = 0 : i64, scratch_operands = 0 : i64, tpu.core_type = #tpu.core_type<tc>, window_params = [{transform_indices = @transform_0, window_bounds = array<i64: 16, 256>}, {transform_indices = @transform_1, window_bounds = array<i64: 16, 1>}, {pipeline_mode = #tpu.pipeline_mode<synchronous>, transform_indices = @transform_2, window_bounds = array<i64: 256, 96>}, {pipeline_mode = #tpu.pipeline_mode<synchronous>, transform_indices = @transform_3, window_bounds = array<i64: 1, 96>}, {pipeline_mode = #tpu.pipeline_mode<synchronous>, transform_indices = @transform_4, window_bounds = array<i64: 1, 96>}, {pipeline_mode = #tpu.pipeline_mode<synchronous>, transform_indices = @transform_5, window_bounds = array<i64: 96, 96>}, {pipeline_mode = #tpu.pipeline_mode<synchronous>, transform_indices = @transform_6, window_bounds = array<i64: 1, 96>}, {pipeline_mode = #tpu.pipeline_mode<synchronous>, transform_indices = @transform_7, window_bounds = array<i64: 96, 10>}, {pipeline_mode = #tpu.pipeline_mode<synchronous>, transform_indices = @transform_8, window_bounds = array<i64: 1, 10>}, {transform_indices = @transform_9, window_bounds = array<i64: 16, 10>}]} {
    %c0 = arith.constant 0 : index
    %c0_0 = arith.constant 0 : index
    %0 = vector.load %arg1[%c0, %c0_0] : memref<16x256xf32, #tpu.memory_space<vmem>>, vector<16x256xf32>
    %1 = arith.truncf %0 : vector<16x256xf32> to vector<16x256xbf16>
    %c0_1 = arith.constant 0 : index
    %c0_2 = arith.constant 0 : index
    %2 = vector.load %arg3[%c0_1, %c0_2] : memref<256x96xbf16, #tpu.memory_space<vmem>>, vector<256x96xbf16>
    %cst = arith.constant dense<0.000000e+00> : vector<16x96xf32>
    %3 = tpu.matmul %1, %2, %cst {dimension_numbers = #tpu.dot_dimension_numbers<[1], [0], [0], [1], [0, 0, 1, 1], [], []>} : vector<16x256xbf16>, vector<256x96xbf16>, vector<16x96xf32> -> vector<16x96xf32>
    %c0_3 = arith.constant 0 : index
    %c0_4 = arith.constant 0 : index
    %4 = vector.load %arg2[%c0_3, %c0_4] : memref<16x1xf32, #tpu.memory_space<vmem>>, vector<16x1xf32>
    %c0_5 = arith.constant 0 : index
    %c0_6 = arith.constant 0 : index
    %5 = vector.load %arg4[%c0_5, %c0_6] : memref<1x96xf32, #tpu.memory_space<vmem>>, vector<1x96xf32>
    %6 = vector.broadcast %4 : vector<16x1xf32> to vector<16x96xf32>
    %7 = vector.broadcast %5 : vector<1x96xf32> to vector<16x96xf32>
    %8 = arith.mulf %6, %7 : vector<16x96xf32>
    %9 = arith.addf %3, %8 : vector<16x96xf32>
    %c0_7 = arith.constant 0 : index
    %c0_8 = arith.constant 0 : index
    %10 = vector.load %arg5[%c0_7, %c0_8] : memref<1x96xf32, #tpu.memory_space<vmem>>, vector<1x96xf32>
    %11 = vector.broadcast %10 : vector<1x96xf32> to vector<16x96xf32>
    %12 = arith.addf %9, %11 : vector<16x96xf32>
    %cst_9 = arith.constant 0.000000e+00 : f32
    %13 = vector.broadcast %cst_9 : f32 to vector<16x96xf32>
    %14 = arith.maximumf %12, %13 : vector<16x96xf32>
    %15 = arith.truncf %14 : vector<16x96xf32> to vector<16x96xbf16>
    %c0_10 = arith.constant 0 : index
    %c0_11 = arith.constant 0 : index
    %16 = vector.load %arg6[%c0_10, %c0_11] : memref<96x96xbf16, #tpu.memory_space<vmem>>, vector<96x96xbf16>
    %cst_12 = arith.constant dense<0.000000e+00> : vector<16x96xf32>
    %17 = tpu.matmul %15, %16, %cst_12 {dimension_numbers = #tpu.dot_dimension_numbers<[1], [0], [0], [1], [0, 0, 1, 1], [], []>} : vector<16x96xbf16>, vector<96x96xbf16>, vector<16x96xf32> -> vector<16x96xf32>
    %c0_13 = arith.constant 0 : index
    %c0_14 = arith.constant 0 : index
    %18 = vector.load %arg7[%c0_13, %c0_14] : memref<1x96xf32, #tpu.memory_space<vmem>>, vector<1x96xf32>
    %19 = vector.broadcast %18 : vector<1x96xf32> to vector<16x96xf32>
    %20 = arith.addf %17, %19 : vector<16x96xf32>
    %cst_15 = arith.constant 0.000000e+00 : f32
    %21 = vector.broadcast %cst_15 : f32 to vector<16x96xf32>
    %22 = arith.maximumf %20, %21 : vector<16x96xf32>
    %23 = arith.truncf %22 : vector<16x96xf32> to vector<16x96xbf16>
    %c0_16 = arith.constant 0 : index
    %c0_17 = arith.constant 0 : index
    %24 = vector.load %arg8[%c0_16, %c0_17] : memref<96x10xbf16, #tpu.memory_space<vmem>>, vector<96x10xbf16>
    %cst_18 = arith.constant dense<0.000000e+00> : vector<16x10xf32>
    %25 = tpu.matmul %23, %24, %cst_18 {dimension_numbers = #tpu.dot_dimension_numbers<[1], [0], [0], [1], [0, 0, 1, 1], [], []>} : vector<16x96xbf16>, vector<96x10xbf16>, vector<16x10xf32> -> vector<16x10xf32>
    %c0_19 = arith.constant 0 : index
    %c0_20 = arith.constant 0 : index
    %26 = vector.load %arg9[%c0_19, %c0_20] : memref<1x10xf32, #tpu.memory_space<vmem>>, vector<1x10xf32>
    %27 = vector.broadcast %26 : vector<1x10xf32> to vector<16x10xf32>
    %28 = arith.addf %25, %27 : vector<16x10xf32>
    %c0_21 = arith.constant 0 : index
    %c0_22 = arith.constant 0 : index
    %29 = vector.load %arg10[%c0_21, %c0_22] : memref<16x10xf32, #tpu.memory_space<vmem>>, vector<16x10xf32>
    tpu.vector_store %arg10[%c0_21, %c0_22], %28 {strides = array<i32>} : memref<16x10xf32, #tpu.memory_space<vmem>>, vector<16x10xf32>,
    return
  }
  func.func @transform_0(%arg0: i32) -> (i32, i32) {
    %c0_i32 = arith.constant 0 : i32
    %c0_i32_0 = arith.constant 0 : i32
    return %arg0, %c0_i32 : i32, i32
  }
  func.func @transform_1(%arg0: i32) -> (i32, i32) {
    %c0_i32 = arith.constant 0 : i32
    %c0_i32_0 = arith.constant 0 : i32
    return %arg0, %c0_i32 : i32, i32
  }
  func.func @transform_2(%arg0: i32) -> (i32, i32) {
    %c0_i32 = arith.constant 0 : i32
    %c0_i32_0 = arith.constant 0 : i32
    %c0_i32_1 = arith.constant 0 : i32
    return %c0_i32, %c0_i32_0 : i32, i32
  }
  func.func @transform_3(%arg0: i32) -> (i32, i32) {
    %c0_i32 = arith.constant 0 : i32
    %c0_i32_0 = arith.constant 0 : i32
    %c0_i32_1 = arith.constant 0 : i32
    return %c0_i32, %c0_i32_0 : i32, i32
  }
  func.func @transform_4(%arg0: i32) -> (i32, i32) {
    %c0_i32 = arith.constant 0 : i32
    %c0_i32_0 = arith.constant 0 : i32
    %c0_i32_1 = arith.constant 0 : i32
    return %c0_i32, %c0_i32_0 : i32, i32
  }
  func.func @transform_5(%arg0: i32) -> (i32, i32) {
    %c0_i32 = arith.constant 0 : i32
    %c0_i32_0 = arith.constant 0 : i32
    %c0_i32_1 = arith.constant 0 : i32
    return %c0_i32, %c0_i32_0 : i32, i32
  }
  func.func @transform_6(%arg0: i32) -> (i32, i32) {
    %c0_i32 = arith.constant 0 : i32
    %c0_i32_0 = arith.constant 0 : i32
    %c0_i32_1 = arith.constant 0 : i32
    return %c0_i32, %c0_i32_0 : i32, i32
  }
  func.func @transform_7(%arg0: i32) -> (i32, i32) {
    %c0_i32 = arith.constant 0 : i32
    %c0_i32_0 = arith.constant 0 : i32
    %c0_i32_1 = arith.constant 0 : i32
    return %c0_i32, %c0_i32_0 : i32, i32
  }
  func.func @transform_8(%arg0: i32) -> (i32, i32) {
    %c0_i32 = arith.constant 0 : i32
    %c0_i32_0 = arith.constant 0 : i32
    %c0_i32_1 = arith.constant 0 : i32
    return %c0_i32, %c0_i32_0 : i32, i32
  }
  func.func @transform_9(%arg0: i32) -> (i32, i32) {
    %c0_i32 = arith.constant 0 : i32
    %c0_i32_0 = arith.constant 0 : i32
    return %arg0, %c0_i32 : i32, i32
  }
}

module attributes {stable_mosaic.version = 11 : i64} {
  func.func @_edge_kernel(%arg0: i32, %arg1: memref<16x256xf32, #tpu.memory_space<vmem>>, %arg2: memref<16x1xf32, #tpu.memory_space<vmem>>, %arg3: memref<16x66xf32, #tpu.memory_space<vmem>>, %arg4: memref<256x64xbf16, #tpu.memory_space<vmem>>, %arg5: memref<256x64xbf16, #tpu.memory_space<vmem>>, %arg6: memref<256x64xbf16, #tpu.memory_space<vmem>>, %arg7: memref<1x64xf32, #tpu.memory_space<vmem>>, %arg8: memref<1x64xf32, #tpu.memory_space<vmem>>, %arg9: memref<1x64xf32, #tpu.memory_space<vmem>>, %arg10: memref<1x64xf32, #tpu.memory_space<vmem>>, %arg11: memref<1x64xf32, #tpu.memory_space<vmem>>, %arg12: memref<1x64xf32, #tpu.memory_space<vmem>>, %arg13: memref<64x64xbf16, #tpu.memory_space<vmem>>, %arg14: memref<64x64xbf16, #tpu.memory_space<vmem>>, %arg15: memref<64x64xbf16, #tpu.memory_space<vmem>>, %arg16: memref<1x64xf32, #tpu.memory_space<vmem>>, %arg17: memref<1x64xf32, #tpu.memory_space<vmem>>, %arg18: memref<1x64xf32, #tpu.memory_space<vmem>>, %arg19: memref<64x96xbf16, #tpu.memory_space<vmem>>, %arg20: memref<1x96xf32, #tpu.memory_space<vmem>>, %arg21: memref<96x96xbf16, #tpu.memory_space<vmem>>, %arg22: memref<1x96xf32, #tpu.memory_space<vmem>>, %arg23: memref<96x2xbf16, #tpu.memory_space<vmem>>, %arg24: memref<1x2xf32, #tpu.memory_space<vmem>>, %arg25: memref<16x66xf32, #tpu.memory_space<vmem>>) attributes {dimension_semantics = [#tpu.dimension_semantics<parallel>], iteration_bounds = array<i64: 2>, scalar_prefetch = 0 : i64, scratch_operands = 0 : i64, tpu.core_type = #tpu.core_type<tc>, window_params = [{transform_indices = @transform_0, window_bounds = array<i64: 16, 256>}, {transform_indices = @transform_1, window_bounds = array<i64: 16, 1>}, {transform_indices = @transform_2, window_bounds = array<i64: 16, 66>}, {pipeline_mode = #tpu.pipeline_mode<synchronous>, transform_indices = @transform_3, window_bounds = array<i64: 256, 64>}, {pipeline_mode = #tpu.pipeline_mode<synchronous>, transform_indices = @transform_4, window_bounds = array<i64: 256, 64>}, {pipeline_mode = #tpu.pipeline_mode<synchronous>, transform_indices = @transform_5, window_bounds = array<i64: 256, 64>}, {pipeline_mode = #tpu.pipeline_mode<synchronous>, transform_indices = @transform_6, window_bounds = array<i64: 1, 64>}, {pipeline_mode = #tpu.pipeline_mode<synchronous>, transform_indices = @transform_7, window_bounds = array<i64: 1, 64>}, {pipeline_mode = #tpu.pipeline_mode<synchronous>, transform_indices = @transform_8, window_bounds = array<i64: 1, 64>}, {pipeline_mode = #tpu.pipeline_mode<synchronous>, transform_indices = @transform_9, window_bounds = array<i64: 1, 64>}, {pipeline_mode = #tpu.pipeline_mode<synchronous>, transform_indices = @transform_10, window_bounds = array<i64: 1, 64>}, {pipeline_mode = #tpu.pipeline_mode<synchronous>, transform_indices = @transform_11, window_bounds = array<i64: 1, 64>}, {pipeline_mode = #tpu.pipeline_mode<synchronous>, transform_indices = @transform_12, window_bounds = array<i64: 64, 64>}, {pipeline_mode = #tpu.pipeline_mode<synchronous>, transform_indices = @transform_13, window_bounds = array<i64: 64, 64>}, {pipeline_mode = #tpu.pipeline_mode<synchronous>, transform_indices = @transform_14, window_bounds = array<i64: 64, 64>}, {pipeline_mode = #tpu.pipeline_mode<synchronous>, transform_indices = @transform_15, window_bounds = array<i64: 1, 64>}, {pipeline_mode = #tpu.pipeline_mode<synchronous>, transform_indices = @transform_16, window_bounds = array<i64: 1, 64>}, {pipeline_mode = #tpu.pipeline_mode<synchronous>, transform_indices = @transform_17, window_bounds = array<i64: 1, 64>}, {pipeline_mode = #tpu.pipeline_mode<synchronous>, transform_indices = @transform_18, window_bounds = array<i64: 64, 96>}, {pipeline_mode = #tpu.pipeline_mode<synchronous>, transform_indices = @transform_19, window_bounds = array<i64: 1, 96>}, {pipeline_mode = #tpu.pipeline_mode<synchronous>, transform_indices = @transform_20, window_bounds = array<i64: 96, 96>}, {pipeline_mode = #tpu.pipeline_mode<synchronous>, transform_indices = @transform_21, window_bounds = array<i64: 1, 96>}, {pipeline_mode = #tpu.pipeline_mode<synchronous>, transform_indices = @transform_22, window_bounds = array<i64: 96, 2>}, {pipeline_mode = #tpu.pipeline_mode<synchronous>, transform_indices = @transform_23, window_bounds = array<i64: 1, 2>}, {transform_indices = @transform_24, window_bounds = array<i64: 16, 66>}]} {
    %c0 = arith.constant 0 : index
    %c0_0 = arith.constant 0 : index
    %0 = vector.load %arg1[%c0, %c0_0] : memref<16x256xf32, #tpu.memory_space<vmem>>, vector<16x256xf32>
    %1 = arith.truncf %0 : vector<16x256xf32> to vector<16x256xbf16>
    %c0_1 = arith.constant 0 : index
    %c0_2 = arith.constant 0 : index
    %2 = vector.load %arg2[%c0_1, %c0_2] : memref<16x1xf32, #tpu.memory_space<vmem>>, vector<16x1xf32>
    %c0_3 = arith.constant 0 : index
    %c0_4 = arith.constant 0 : index
    %3 = vector.load %arg3[%c0_3, %c0_4] : memref<16x66xf32, #tpu.memory_space<vmem>>, vector<16x64xf32>
    %4 = arith.truncf %3 : vector<16x64xf32> to vector<16x64xbf16>
    %c0_5 = arith.constant 0 : index
    %c0_6 = arith.constant 0 : index
    %5 = vector.load %arg4[%c0_5, %c0_6] : memref<256x64xbf16, #tpu.memory_space<vmem>>, vector<256x64xbf16>
    %cst = arith.constant dense<0.000000e+00> : vector<16x64xf32>
    %6 = tpu.matmul %1, %5, %cst {dimension_numbers = #tpu.dot_dimension_numbers<[1], [0], [0], [1], [0, 0, 1, 1], [], []>} : vector<16x256xbf16>, vector<256x64xbf16>, vector<16x64xf32> -> vector<16x64xf32>
    %c0_7 = arith.constant 0 : index
    %c0_8 = arith.constant 0 : index
    %7 = vector.load %arg7[%c0_7, %c0_8] : memref<1x64xf32, #tpu.memory_space<vmem>>, vector<1x64xf32>
    %8 = vector.broadcast %2 : vector<16x1xf32> to vector<16x64xf32>
    %9 = vector.broadcast %7 : vector<1x64xf32> to vector<16x64xf32>
    %10 = arith.mulf %8, %9 : vector<16x64xf32>
    %11 = arith.addf %6, %10 : vector<16x64xf32>
    %c0_9 = arith.constant 0 : index
    %c0_10 = arith.constant 0 : index
    %12 = vector.load %arg10[%c0_9, %c0_10] : memref<1x64xf32, #tpu.memory_space<vmem>>, vector<1x64xf32>
    %13 = vector.broadcast %12 : vector<1x64xf32> to vector<16x64xf32>
    %14 = arith.addf %11, %13 : vector<16x64xf32>
    %c0_11 = arith.constant 0 : index
    %c0_12 = arith.constant 0 : index
    %15 = vector.load %arg13[%c0_11, %c0_12] : memref<64x64xbf16, #tpu.memory_space<vmem>>, vector<64x64xbf16>
    %cst_13 = arith.constant dense<0.000000e+00> : vector<16x64xf32>
    %16 = tpu.matmul %4, %15, %cst_13 {dimension_numbers = #tpu.dot_dimension_numbers<[1], [0], [0], [1], [0, 0, 1, 1], [], []>} : vector<16x64xbf16>, vector<64x64xbf16>, vector<16x64xf32> -> vector<16x64xf32>
    %c0_14 = arith.constant 0 : index
    %c0_15 = arith.constant 0 : index
    %17 = vector.load %arg16[%c0_14, %c0_15] : memref<1x64xf32, #tpu.memory_space<vmem>>, vector<1x64xf32>
    %18 = vector.broadcast %17 : vector<1x64xf32> to vector<16x64xf32>
    %19 = arith.addf %16, %18 : vector<16x64xf32>
    %20 = arith.addf %14, %19 : vector<16x64xf32>
    %21 = arith.negf %20 : vector<16x64xf32>
    %22 = math.exp %21 : vector<16x64xf32>
    %cst_16 = arith.constant 1.000000e+00 : f32
    %23 = vector.broadcast %cst_16 : f32 to vector<16x64xf32>
    %24 = arith.addf %23, %22 : vector<16x64xf32>
    %25 = arith.divf %23, %24 : vector<16x64xf32>
    %c0_17 = arith.constant 0 : index
    %c0_18 = arith.constant 0 : index
    %26 = vector.load %arg5[%c0_17, %c0_18] : memref<256x64xbf16, #tpu.memory_space<vmem>>, vector<256x64xbf16>
    %cst_19 = arith.constant dense<0.000000e+00> : vector<16x64xf32>
    %27 = tpu.matmul %1, %26, %cst_19 {dimension_numbers = #tpu.dot_dimension_numbers<[1], [0], [0], [1], [0, 0, 1, 1], [], []>} : vector<16x256xbf16>, vector<256x64xbf16>, vector<16x64xf32> -> vector<16x64xf32>
    %c0_20 = arith.constant 0 : index
    %c0_21 = arith.constant 0 : index
    %28 = vector.load %arg8[%c0_20, %c0_21] : memref<1x64xf32, #tpu.memory_space<vmem>>, vector<1x64xf32>
    %29 = vector.broadcast %2 : vector<16x1xf32> to vector<16x64xf32>
    %30 = vector.broadcast %28 : vector<1x64xf32> to vector<16x64xf32>
    %31 = arith.mulf %29, %30 : vector<16x64xf32>
    %32 = arith.addf %27, %31 : vector<16x64xf32>
    %c0_22 = arith.constant 0 : index
    %c0_23 = arith.constant 0 : index
    %33 = vector.load %arg11[%c0_22, %c0_23] : memref<1x64xf32, #tpu.memory_space<vmem>>, vector<1x64xf32>
    %34 = vector.broadcast %33 : vector<1x64xf32> to vector<16x64xf32>
    %35 = arith.addf %32, %34 : vector<16x64xf32>
    %c0_24 = arith.constant 0 : index
    %c0_25 = arith.constant 0 : index
    %36 = vector.load %arg14[%c0_24, %c0_25] : memref<64x64xbf16, #tpu.memory_space<vmem>>, vector<64x64xbf16>
    %cst_26 = arith.constant dense<0.000000e+00> : vector<16x64xf32>
    %37 = tpu.matmul %4, %36, %cst_26 {dimension_numbers = #tpu.dot_dimension_numbers<[1], [0], [0], [1], [0, 0, 1, 1], [], []>} : vector<16x64xbf16>, vector<64x64xbf16>, vector<16x64xf32> -> vector<16x64xf32>
    %c0_27 = arith.constant 0 : index
    %c0_28 = arith.constant 0 : index
    %38 = vector.load %arg17[%c0_27, %c0_28] : memref<1x64xf32, #tpu.memory_space<vmem>>, vector<1x64xf32>
    %39 = vector.broadcast %38 : vector<1x64xf32> to vector<16x64xf32>
    %40 = arith.addf %37, %39 : vector<16x64xf32>
    %41 = arith.addf %35, %40 : vector<16x64xf32>
    %42 = arith.negf %41 : vector<16x64xf32>
    %43 = math.exp %42 : vector<16x64xf32>
    %cst_29 = arith.constant 1.000000e+00 : f32
    %44 = vector.broadcast %cst_29 : f32 to vector<16x64xf32>
    %45 = arith.addf %44, %43 : vector<16x64xf32>
    %46 = arith.divf %44, %45 : vector<16x64xf32>
    %c0_30 = arith.constant 0 : index
    %c0_31 = arith.constant 0 : index
    %47 = vector.load %arg6[%c0_30, %c0_31] : memref<256x64xbf16, #tpu.memory_space<vmem>>, vector<256x64xbf16>
    %cst_32 = arith.constant dense<0.000000e+00> : vector<16x64xf32>
    %48 = tpu.matmul %1, %47, %cst_32 {dimension_numbers = #tpu.dot_dimension_numbers<[1], [0], [0], [1], [0, 0, 1, 1], [], []>} : vector<16x256xbf16>, vector<256x64xbf16>, vector<16x64xf32> -> vector<16x64xf32>
    %c0_33 = arith.constant 0 : index
    %c0_34 = arith.constant 0 : index
    %49 = vector.load %arg9[%c0_33, %c0_34] : memref<1x64xf32, #tpu.memory_space<vmem>>, vector<1x64xf32>
    %50 = vector.broadcast %2 : vector<16x1xf32> to vector<16x64xf32>
    %51 = vector.broadcast %49 : vector<1x64xf32> to vector<16x64xf32>
    %52 = arith.mulf %50, %51 : vector<16x64xf32>
    %53 = arith.addf %48, %52 : vector<16x64xf32>
    %c0_35 = arith.constant 0 : index
    %c0_36 = arith.constant 0 : index
    %54 = vector.load %arg12[%c0_35, %c0_36] : memref<1x64xf32, #tpu.memory_space<vmem>>, vector<1x64xf32>
    %55 = vector.broadcast %54 : vector<1x64xf32> to vector<16x64xf32>
    %56 = arith.addf %53, %55 : vector<16x64xf32>
    %c0_37 = arith.constant 0 : index
    %c0_38 = arith.constant 0 : index
    %57 = vector.load %arg15[%c0_37, %c0_38] : memref<64x64xbf16, #tpu.memory_space<vmem>>, vector<64x64xbf16>
    %cst_39 = arith.constant dense<0.000000e+00> : vector<16x64xf32>
    %58 = tpu.matmul %4, %57, %cst_39 {dimension_numbers = #tpu.dot_dimension_numbers<[1], [0], [0], [1], [0, 0, 1, 1], [], []>} : vector<16x64xbf16>, vector<64x64xbf16>, vector<16x64xf32> -> vector<16x64xf32>
    %c0_40 = arith.constant 0 : index
    %c0_41 = arith.constant 0 : index
    %59 = vector.load %arg18[%c0_40, %c0_41] : memref<1x64xf32, #tpu.memory_space<vmem>>, vector<1x64xf32>
    %60 = vector.broadcast %59 : vector<1x64xf32> to vector<16x64xf32>
    %61 = arith.addf %58, %60 : vector<16x64xf32>
    %62 = arith.mulf %25, %61 : vector<16x64xf32>
    %63 = arith.addf %56, %62 : vector<16x64xf32>
    %64 = math.tanh %63 : vector<16x64xf32>
    %cst_42 = arith.constant 1.000000e+00 : f32
    %65 = vector.broadcast %cst_42 : f32 to vector<16x64xf32>
    %66 = arith.subf %65, %46 : vector<16x64xf32>
    %67 = arith.mulf %66, %64 : vector<16x64xf32>
    %68 = arith.mulf %46, %3 : vector<16x64xf32>
    %69 = arith.addf %67, %68 : vector<16x64xf32>
    %70 = arith.truncf %69 : vector<16x64xf32> to vector<16x64xbf16>
    %c0_43 = arith.constant 0 : index
    %c0_44 = arith.constant 0 : index
    %71 = vector.load %arg19[%c0_43, %c0_44] : memref<64x96xbf16, #tpu.memory_space<vmem>>, vector<64x96xbf16>
    %cst_45 = arith.constant dense<0.000000e+00> : vector<16x96xf32>
    %72 = tpu.matmul %70, %71, %cst_45 {dimension_numbers = #tpu.dot_dimension_numbers<[1], [0], [0], [1], [0, 0, 1, 1], [], []>} : vector<16x64xbf16>, vector<64x96xbf16>, vector<16x96xf32> -> vector<16x96xf32>
    %c0_46 = arith.constant 0 : index
    %c0_47 = arith.constant 0 : index
    %73 = vector.load %arg20[%c0_46, %c0_47] : memref<1x96xf32, #tpu.memory_space<vmem>>, vector<1x96xf32>
    %74 = vector.broadcast %73 : vector<1x96xf32> to vector<16x96xf32>
    %75 = arith.addf %72, %74 : vector<16x96xf32>
    %cst_48 = arith.constant 0.000000e+00 : f32
    %76 = vector.broadcast %cst_48 : f32 to vector<16x96xf32>
    %77 = arith.maximumf %75, %76 : vector<16x96xf32>
    %78 = arith.truncf %77 : vector<16x96xf32> to vector<16x96xbf16>
    %c0_49 = arith.constant 0 : index
    %c0_50 = arith.constant 0 : index
    %79 = vector.load %arg21[%c0_49, %c0_50] : memref<96x96xbf16, #tpu.memory_space<vmem>>, vector<96x96xbf16>
    %cst_51 = arith.constant dense<0.000000e+00> : vector<16x96xf32>
    %80 = tpu.matmul %78, %79, %cst_51 {dimension_numbers = #tpu.dot_dimension_numbers<[1], [0], [0], [1], [0, 0, 1, 1], [], []>} : vector<16x96xbf16>, vector<96x96xbf16>, vector<16x96xf32> -> vector<16x96xf32>
    %c0_52 = arith.constant 0 : index
    %c0_53 = arith.constant 0 : index
    %81 = vector.load %arg22[%c0_52, %c0_53] : memref<1x96xf32, #tpu.memory_space<vmem>>, vector<1x96xf32>
    %82 = vector.broadcast %81 : vector<1x96xf32> to vector<16x96xf32>
    %83 = arith.addf %80, %82 : vector<16x96xf32>
    %cst_54 = arith.constant 0.000000e+00 : f32
    %84 = vector.broadcast %cst_54 : f32 to vector<16x96xf32>
    %85 = arith.maximumf %83, %84 : vector<16x96xf32>
    %86 = arith.truncf %85 : vector<16x96xf32> to vector<16x96xbf16>
    %c0_55 = arith.constant 0 : index
    %c0_56 = arith.constant 0 : index
    %87 = vector.load %arg23[%c0_55, %c0_56] : memref<96x2xbf16, #tpu.memory_space<vmem>>, vector<96x2xbf16>
    %cst_57 = arith.constant dense<0.000000e+00> : vector<16x2xf32>
    %88 = tpu.matmul %86, %87, %cst_57 {dimension_numbers = #tpu.dot_dimension_numbers<[1], [0], [0], [1], [0, 0, 1, 1], [], []>} : vector<16x96xbf16>, vector<96x2xbf16>, vector<16x2xf32> -> vector<16x2xf32>
    %c0_58 = arith.constant 0 : index
    %c0_59 = arith.constant 0 : index
    %89 = vector.load %arg24[%c0_58, %c0_59] : memref<1x2xf32, #tpu.memory_space<vmem>>, vector<1x2xf32>
    %90 = vector.broadcast %89 : vector<1x2xf32> to vector<16x2xf32>
    %91 = arith.addf %88, %90 : vector<16x2xf32>
    %c0_60 = arith.constant 0 : index
    %c0_61 = arith.constant 0 : index
    %92 = vector.load %arg25[%c0_60, %c0_61] : memref<16x66xf32, #tpu.memory_space<vmem>>, vector<16x64xf32>
    tpu.vector_store %arg25[%c0_60, %c0_61], %69 {strides = array<i32>} : memref<16x66xf32, #tpu.memory_space<vmem>>, vector<16x64xf32>,
    %c0_62 = arith.constant 0 : index
    %c64 = arith.constant 64 : index
    %93 = vector.load %arg25[%c0_62, %c64] : memref<16x66xf32, #tpu.memory_space<vmem>>, vector<16x2xf32>
    tpu.vector_store %arg25[%c0_62, %c64], %91 {strides = array<i32>} : memref<16x66xf32, #tpu.memory_space<vmem>>, vector<16x2xf32>,
    return
  }
  func.func @transform_0(%arg0: i32) -> (i32, i32) {
    %c0_i32 = arith.constant 0 : i32
    %c0_i32_0 = arith.constant 0 : i32
    return %arg0, %c0_i32 : i32, i32
  }
  func.func @transform_1(%arg0: i32) -> (i32, i32) {
    %c0_i32 = arith.constant 0 : i32
    %c0_i32_0 = arith.constant 0 : i32
    return %arg0, %c0_i32 : i32, i32
  }
  func.func @transform_2(%arg0: i32) -> (i32, i32) {
    %c0_i32 = arith.constant 0 : i32
    %c0_i32_0 = arith.constant 0 : i32
    return %arg0, %c0_i32 : i32, i32
  }
  func.func @transform_3(%arg0: i32) -> (i32, i32) {
    %c0_i32 = arith.constant 0 : i32
    %c0_i32_0 = arith.constant 0 : i32
    %c0_i32_1 = arith.constant 0 : i32
    return %c0_i32, %c0_i32_0 : i32, i32
  }
  func.func @transform_4(%arg0: i32) -> (i32, i32) {
    %c0_i32 = arith.constant 0 : i32
    %c0_i32_0 = arith.constant 0 : i32
    %c0_i32_1 = arith.constant 0 : i32
    return %c0_i32, %c0_i32_0 : i32, i32
  }
  func.func @transform_5(%arg0: i32) -> (i32, i32) {
    %c0_i32 = arith.constant 0 : i32
    %c0_i32_0 = arith.constant 0 : i32
    %c0_i32_1 = arith.constant 0 : i32
    return %c0_i32, %c0_i32_0 : i32, i32
  }
  func.func @transform_6(%arg0: i32) -> (i32, i32) {
    %c0_i32 = arith.constant 0 : i32
    %c0_i32_0 = arith.constant 0 : i32
    %c0_i32_1 = arith.constant 0 : i32
    return %c0_i32, %c0_i32_0 : i32, i32
  }
  func.func @transform_7(%arg0: i32) -> (i32, i32) {
    %c0_i32 = arith.constant 0 : i32
    %c0_i32_0 = arith.constant 0 : i32
    %c0_i32_1 = arith.constant 0 : i32
    return %c0_i32, %c0_i32_0 : i32, i32
  }
  func.func @transform_8(%arg0: i32) -> (i32, i32) {
    %c0_i32 = arith.constant 0 : i32
    %c0_i32_0 = arith.constant 0 : i32
    %c0_i32_1 = arith.constant 0 : i32
    return %c0_i32, %c0_i32_0 : i32, i32
  }
  func.func @transform_9(%arg0: i32) -> (i32, i32) {
    %c0_i32 = arith.constant 0 : i32
    %c0_i32_0 = arith.constant 0 : i32
    %c0_i32_1 = arith.constant 0 : i32
    return %c0_i32, %c0_i32_0 : i32, i32
  }
  func.func @transform_10(%arg0: i32) -> (i32, i32) {
    %c0_i32 = arith.constant 0 : i32
    %c0_i32_0 = arith.constant 0 : i32
    %c0_i32_1 = arith.constant 0 : i32
    return %c0_i32, %c0_i32_0 : i32, i32
  }
  func.func @transform_11(%arg0: i32) -> (i32, i32) {
    %c0_i32 = arith.constant 0 : i32
    %c0_i32_0 = arith.constant 0 : i32
    %c0_i32_1 = arith.constant 0 : i32
    return %c0_i32, %c0_i32_0 : i32, i32
  }
  func.func @transform_12(%arg0: i32) -> (i32, i32) {
    %c0_i32 = arith.constant 0 : i32
    %c0_i32_0 = arith.constant 0 : i32
    %c0_i32_1 = arith.constant 0 : i32
    return %c0_i32, %c0_i32_0 : i32, i32
  }
  func.func @transform_13(%arg0: i32) -> (i32, i32) {
    %c0_i32 = arith.constant 0 : i32
    %c0_i32_0 = arith.constant 0 : i32
    %c0_i32_1 = arith.constant 0 : i32
    return %c0_i32, %c0_i32_0 : i32, i32
  }
  func.func @transform_14(%arg0: i32) -> (i32, i32) {
    %c0_i32 = arith.constant 0 : i32
    %c0_i32_0 = arith.constant 0 : i32
    %c0_i32_1 = arith.constant 0 : i32
    return %c0_i32, %c0_i32_0 : i32, i32
  }
  func.func @transform_15(%arg0: i32) -> (i32, i32) {
    %c0_i32 = arith.constant 0 : i32
    %c0_i32_0 = arith.constant 0 : i32
    %c0_i32_1 = arith.constant 0 : i32
    return %c0_i32, %c0_i32_0 : i32, i32
  }
  func.func @transform_16(%arg0: i32) -> (i32, i32) {
    %c0_i32 = arith.constant 0 : i32
    %c0_i32_0 = arith.constant 0 : i32
    %c0_i32_1 = arith.constant 0 : i32
    return %c0_i32, %c0_i32_0 : i32, i32
  }
  func.func @transform_17(%arg0: i32) -> (i32, i32) {
    %c0_i32 = arith.constant 0 : i32
    %c0_i32_0 = arith.constant 0 : i32
    %c0_i32_1 = arith.constant 0 : i32
    return %c0_i32, %c0_i32_0 : i32, i32
  }
  func.func @transform_18(%arg0: i32) -> (i32, i32) {
    %c0_i32 = arith.constant 0 : i32
    %c0_i32_0 = arith.constant 0 : i32
    %c0_i32_1 = arith.constant 0 : i32
    return %c0_i32, %c0_i32_0 : i32, i32
  }
  func.func @transform_19(%arg0: i32) -> (i32, i32) {
    %c0_i32 = arith.constant 0 : i32
    %c0_i32_0 = arith.constant 0 : i32
    %c0_i32_1 = arith.constant 0 : i32
    return %c0_i32, %c0_i32_0 : i32, i32
  }
  func.func @transform_20(%arg0: i32) -> (i32, i32) {
    %c0_i32 = arith.constant 0 : i32
    %c0_i32_0 = arith.constant 0 : i32
    %c0_i32_1 = arith.constant 0 : i32
    return %c0_i32, %c0_i32_0 : i32, i32
  }
  func.func @transform_21(%arg0: i32) -> (i32, i32) {
    %c0_i32 = arith.constant 0 : i32
    %c0_i32_0 = arith.constant 0 : i32
    %c0_i32_1 = arith.constant 0 : i32
    return %c0_i32, %c0_i32_0 : i32, i32
  }
  func.func @transform_22(%arg0: i32) -> (i32, i32) {
    %c0_i32 = arith.constant 0 : i32
    %c0_i32_0 = arith.constant 0 : i32
    %c0_i32_1 = arith.constant 0 : i32
    return %c0_i32, %c0_i32_0 : i32, i32
  }
  func.func @transform_23(%arg0: i32) -> (i32, i32) {
    %c0_i32 = arith.constant 0 : i32
    %c0_i32_0 = arith.constant 0 : i32
    %c0_i32_1 = arith.constant 0 : i32
    return %c0_i32, %c0_i32_0 : i32, i32
  }
  func.func @transform_24(%arg0: i32) -> (i32, i32) {
    %c0_i32 = arith.constant 0 : i32
    %c0_i32_0 = arith.constant 0 : i32
    return %arg0, %c0_i32 : i32, i32
  }
}

</mosaic_0001>

<bundles_post_ra>
// kernel: custom-call.4
= control target key start
LH: loop header
LB: loop body
LE: loop exit
PB: predicated region body
PF: predicated region fallthrough
CT: control target
= control target key end

     0   :  { %s6_s0 = inlined_call_operand.vmem [shape: f32[3,128,2], index: 0, kind: output, shape index: {}]  }

// kernel: closed_call.19
= control target key start
LH: loop header
LB: loop body
LE: loop exit
PB: predicated region body
PF: predicated region fallthrough
CT: control target
= control target key end

     0   :  { %s1061_s30 = smov 0   ;;  %s1209_s0 = inlined_call_operand.vmem [shape: f32[32,256], index: 0, kind: input, shape index: {}]   ;;  %s1210_s1 = inlined_call_operand.vmem [shape: f32[32,1], index: 1, kind: input, shape index: {}]   ;;  %s1211_s2 = inlined_call_operand.vmem [shape: bf16[256,96], index: 2, kind: input, shape index: {}]   ;;  %s1212_s3 = inlined_call_operand.vmem [shape: f32[1,96], index: 3, kind: input, shape index: {}]   ;;  %s1213_s4 = inlined_call_operand.vmem [shape: f32[1,96], index: 4, kind: input, shape index: {}]   ;;  %s1214_s5 = inlined_call_operand.vmem [shape: bf16[96,96], index: 5, kind: input, shape index: {}]   ;;  %s1215_s6 = inlined_call_operand.vmem [shape: f32[1,96], index: 6, kind: input, shape index: {}]   ;;  %s1216_s7 = inlined_call_operand.vmem [shape: bf16[96,10], index: 7, kind: input, shape index: {}]   ;;  %s1217_s8 = inlined_call_operand.vmem [shape: f32[1,10], index: 8, kind: input, shape index: {}]   ;;  %s1218_s9 = inlined_call_operand.vmem [shape: f32[32,10], index: 9, kind: output, shape index: {}]  }
   0x1 LB: > { %s843_s10 = sadd.s32 4294967295, %s1006_s30   ;;  %p847_p0 = scmp.ge.s32.totalorder %s1006_s30, 1  ;;  %s1006_s30 = sphi %s1061_s30, %s19_s30  }
   0x2   : > { %p300_p1 = scmp.lt.s32.totalorder %s1006_s30, 3 }
   0x4   : > { %p301_p2 = pnand %p847_p0, %p300_p1 }
   0x5   : > { %v972_v0 = vld [vmem:[%s1211_s2 + $0x40] sm:$0xff] (!%p301_p2)   ;;  %s848_s13 = sshll.u32 (!%p301_p2), %s843_s10, 1  ;;  %v974_v2 = vld [vmem:[%s1211_s2 + $0x48] sm:$0xff] (!%p301_p2)   ;;  %v1008_v4 = vmov (!%p301_p2), 0   ;;  %v976_v5 = vld [vmem:[%s1211_s2 + $0x50] sm:$0xff] (!%p301_p2)   ;;  %v1009_v6 = vmov (!%p301_p2), 0.0  }
   0x6   : > { %304 = sbr.rel (%p301_p2) target bundleno = 700 (0x2bc), region = 56  ;;  %v973_v1 = vld [vmem:[%s1211_s2] sm:$0xff] (!%p301_p2)   ;;  %p343_p3 = scmp.lt.s32.totalorder (!%p301_p2), %s848_s13, 3  ;;  %892 = vmatprep.subr.bf16.mxu0 (!%p301_p2), %v972_v0  ;;  %v975_v3 = vld [vmem:[%s1211_s2 + $0x8] sm:$0xff] (!%p301_p2)   ;;  %971 = vset.pattern.permute.xlu0 (!%p301_p2), %v1008_v4  ;;  %v977_v7 = vld [vmem:[%s1211_s2 + $0x10] sm:$0xff] (!%p301_p2)   ;;  %vm1010_vm0 = vmmov (!%p301_p2), 0  }
   0x7   : > { %893 = vmatpush3.bf16.msra.mxu0 (!%p301_p2), %v973_v1  ;;  %928 = vmatprep.subr.bf16.mxu1 (!%p301_p2), %v1009_v6  ;;  %v978_v8 = vld [vmem:[%s1211_s2 + $0x58] sm:$0xff] (!%p301_p2)   ;;  %v980_v10 = vld [vmem:[%s1211_s2 + $0x60] sm:$0xff] (!%p301_p2)   ;;  %v982_v12 = vld [vmem:[%s1211_s2 + $0x68] sm:$0xff] (!%p301_p2)   ;;  %vm625_vm1 = vcmask (!%p301_p2), 785408   ;;  %vm772_vm2 = vcmask (!%p301_p2), 80896  }
   0x8   : > { %894 = vmatprep.subr.bf16.mxu0 (!%p301_p2), %v974_v2  ;;  %v979_v9 = vld [vmem:[%s1211_s2 + $0x18] sm:$0xff] (!%p301_p2)   ;;  %v981_v11 = vld [vmem:[%s1211_s2 + $0x20] sm:$0xff] (!%p301_p2)   ;;  %v983_v15 = vld [vmem:[%s1211_s2 + $0x28] sm:$0xff] (!%p301_p2)   ;;  %940 = vmatprep.mubr.msk.bf16.mxu1 (!%p301_p2), %vm1010_vm0, %v1009_v6 }
   0x9   : > { %v984_v18 = vld [vmem:[%s1211_s2 + $0x70] sm:$0xff] (!%p301_p2)   ;;  %v988_v19 = vld [vmem:[%s1214_s5] sm:$0xff] (!%p301_p2)   ;;  %v989_v21 = vld [vmem:[%s1214_s5 + $0x8] sm:$0xff] (!%p301_p2)  }
   0xa   : > { %929 = vmatpush3.bf16.msra.mxu1 (!%p301_p2), %v988_v19  ;;  %v985_v22 = vld [vmem:[%s1211_s2 + $0x30] sm:$0xff] (!%p301_p2)   ;;  %v986_v23 = vld [vmem:[%s1211_s2 + $0x78] sm:$0xff] (!%p301_p2)   ;;  %v992_v30 = vld [vmem:[%s1214_s5 + $0x20] sm:$0xff] (!%p301_p2)  }
   0xb   : > { %895 = vmatpush3.bf16.msra.mxu0 (!%p301_p2), %v975_v3  ;;  %930 = vmatprep.subr.bf16.mxu1 (!%p301_p2), %v1009_v6  ;;  %v990_v24 = vld [vmem:[%s1214_s5 + $0x10] sm:$0xff] (!%p301_p2)   ;;  %v987_v25 = vld [vmem:[%s1211_s2 + $0x38] sm:$0xff] (!%p301_p2)   ;;  %v993_v31 = vld [vmem:[%s1214_s5 + $0x28] sm:$0xff] (!%p301_p2)  }
   0xc   : > { %896 = vmatprep.subr.bf16.mxu0 (!%p301_p2), %v976_v5  ;;  %v991_v29 = vld [vmem:[%s1214_s5 + $0x18] sm:$0xff] (!%p301_p2)   ;;  %v855_v33 = vld [vmem:[%s1212_s3] ss:$0 sm:$0xff] (!%p301_p2)  ;;  %v995_v52 = vld [vmem:[%s1216_s7 + $0x8] sm:$0xff] (!%p301_p2)  }
   0xd   : > { %s1220_s13 = smov (!%p343_p3, %s848_s13), 3  ;;  %v872_v40 = vld [vmem:[%s1213_s4] ss:$0 sm:$0xff]  ;;  %v996_v53 = vld [vmem:[%s1216_s7 + $0x10] sm:$0xff]   ;;  %v997_v54 = vld [vmem:[%s1216_s7 + $0x18] sm:$0xff]  }
   0xe   : > { %s891_s26 = sshll.u32 %s1220_s13, 4  ;;  %s852_s29 = sshll.u32 %s1220_s13, 3  ;;  %931 = vmatpush3.bf16.msra.mxu1 %v989_v21  ;;  %v994_v50 = vld [vmem:[%s1216_s7] sm:$0xff]   ;;  %v999_v56 = vld [vmem:[%s1216_s7 + $0x28] sm:$0xff]  }
   0xf   : > { %897 = vmatpush3.bf16.msra.mxu0 %v977_v7  ;;  %s1104_s15 = scalar_lea.vmem %s1209_s0, %s891_s26  ;;  %s353_s18 = scalar_lea.vmem %s1210_s1, %s852_s29  ;;  %932 = vmatprep.subr.bf16.mxu1 %v1009_v6  ;;  %v998_v55 = vld [vmem:[%s1216_s7 + $0x20] sm:$0xff]  }
  0x10   : > { %898 = vmatprep.subr.bf16.mxu0 %v978_v8  ;;  %v363_v13 = vld [vmem:[%s1104_s15 + $0x8] sm:$0xff]  ;;  %v365_v14 = vld [vmem:[%s1104_s15 + $0x18] sm:$0xff]  ;;  %v400_v17 = vld [vmem:[%s353_s18] sm:$0xff]  ;;  %s359_s12 = scalar_lea.vmem %s1218_s9, %s852_s29 }
  0x11   : > { %v367_v16 = vpack.c.bf16 %v365_v14, %v363_v13  ;;  %405 = vperm.xlu0 %971, %v400_v17   ;;  %v401_v20 = vld [vmem:[%s353_s18 + $0x8] sm:$0xff]  ;;  %v362_v26 = vld [vmem:[%s1104_s15] sm:$0xff]  ;;  %v364_v27 = vld [vmem:[%s1104_s15 + $0x10] sm:$0xff] }
  0x12   : > { %933 = vmatpush3.bf16.msra.mxu1 %v990_v24  ;;  %v366_v28 = vpack.c.bf16 %v364_v27, %v362_v26  ;;  %v873_v57 = vld [vmem:[%s1215_s6] ss:$0 sm:$0xff] }
  0x13   : > { %899 = vmatpush3.bf16.msra.mxu0 %v979_v9  ;;  %549 = vmatprep.mubr.bf16.mxu0 %v367_v16  ;;  %v881_v3 = vld [vmem:[%s1217_s8] ss:$0 sm:$0xff] }
  0x14   : > { %900 = vmatprep.subr.bf16.mxu0 %v980_v10  ;;  %934 = vmatprep.subr.bf16.mxu1 %v1009_v6 }
  0x15   : > { %410 = vperm.xlu0 %971, %v401_v20  }
  0x16   : > { %935 = vmatpush3.bf16.msra.mxu1 %v991_v29 }
  0x17   : > { %901 = vmatpush3.bf16.msra.mxu0 %v981_v11  ;;  %936 = vmatprep.subr.bf16.mxu1 %v1009_v6 }
  0x18   : > { %902 = vmatprep.subr.bf16.mxu0 %v982_v12 }
  0x1a   : > { %937 = vmatpush3.bf16.msra.mxu1 %v992_v30 }
  0x1b   : > { %903 = vmatpush3.bf16.msra.mxu0 %v983_v15  ;;  %938 = vmatprep.subr.bf16.mxu1 %v1009_v6 }
  0x1c   : > { %904 = vmatprep.subr.bf16.mxu0 %v984_v18 }
  0x1e   : > { %939 = vmatpush3.bf16.msra.mxu1 %v993_v31 }
  0x1f   : > { %905 = vmatpush3.bf16.msra.mxu0 %v985_v22  ;;  %944 = vmatprep.subr.bf16.mxu1 %v1009_v6 }
  0x20   : > { %906 = vmatprep.subr.bf16.mxu0 %v986_v23 }
  0x23   : > { %907 = vmatpush3.bf16.msra.mxu0 %v987_v25 }
  0x26   : > { %550 = vmatmul.mubr.bf16.vlgmr.msra.gmra.mrb[0].mxu0 %v366_v28 }
  0x90   : > { %v406_v32 = vpop.permute.xlu0 %405 }
  0x91   : > { %v419_v37 = vmul.f32 %v855_v33, %v406_v32 }
  0x94   : > { %v411_v35 = vpop.permute.xlu0 %410 }
  0x95   : > { %v420_v42 = vmul.f32 %v855_v33, %v411_v35 }
  0xf9   : > { %v908_v34 = vpop.f32.mrb[0].mxu0 }
  0xfa   : > { %v909_v36 = vpop.f32.mrb[1].mxu0 }
  0xfb   : > { %v910_v38 = vadd.f32 %v909_v36, %v908_v34  ;;  %v911_v39 = vpop.f32.mrb[2].mxu0 }
  0xfc   : > { %v912_v41 = vpop.f32.mrb[3].mxu0 }
  0xfd   : > { %v552_v43 = vadd.f32 %v910_v38, %v419_v37  ;;  %v913_v44 = vadd.f32 %v912_v41, %v911_v39 }
  0xff   : > { %v565_v45 = vadd.f32 %v872_v40, %v552_v43  ;;  %v555_v46 = vadd.f32 %v913_v44, %v420_v42 }
 0x101   : > { %v566_v47 = vadd.f32 %v872_v40, %v555_v46  ;;  %v567_v48 = vmax.f32 %v565_v45, 0.0 }
 0x103   : > { %v568_v49 = vmax.f32 %v566_v47, 0.0 }
 0x105   : > { %v569_v51 = vpack.c.bf16 %v568_v49, %v567_v48 }
 0x107   : > { %941 = vmatmul.mubr.msk.bf16.vlgmr.msra.gmra.mrb[0].mxu1 %vm625_vm1, %v569_v51 }
 0x108   : > { %945 = vmatpush3.bf16.msra.mxu1 %v994_v50  ;;  %956 = vmatprep.mubr.msk.bf16.mxu1 %vm1010_vm0, %v1009_v6 }
 0x109   : > { %946 = vmatprep.subr.bf16.mxu1 %v1009_v6 }
 0x10c   : > { %947 = vmatpush3.bf16.msra.mxu1 %v995_v52 }
 0x10d   : > { %948 = vmatprep.subr.bf16.mxu1 %v1009_v6 }
 0x110   : > { %949 = vmatpush3.bf16.msra.mxu1 %v996_v53 }
 0x111   : > { %950 = vmatprep.subr.bf16.mxu1 %v1009_v6 }
 0x114   : > { %951 = vmatpush3.bf16.msra.mxu1 %v997_v54 }
 0x115   : > { %952 = vmatprep.subr.bf16.mxu1 %v1009_v6 }
 0x118   : > { %953 = vmatpush3.bf16.msra.mxu1 %v998_v55 }
 0x119   : > { %954 = vmatprep.subr.bf16.mxu1 %v1009_v6 }
 0x11c   : > { %955 = vmatpush3.bf16.msra.mxu1 %v999_v56 }
 0x1da   : > { %v663_v58 = vpop.f32.mrb[0].mxu1 }
 0x1db   : > { %v664_v59 = vadd.f32 %v873_v57, %v663_v58  ;;  %v942_v60 = vpop.f32.mrb[1].mxu1 }
 0x1dc   : > { %v666_v61 = vpop.f32.mrb[2].mxu1 }
 0x1dd   : > { %v667_v62 = vadd.f32 %v873_v57, %v666_v61  ;;  %v943_v63 = vpop.f32.mrb[3].mxu1  ;;  %v670_v0 = vmax.f32 %v664_v59, 0.0 }
 0x1df   : > { %v671_v1 = vmax.f32 %v667_v62, 0.0 }
 0x1e1   : > { %v672_v2 = vpack.c.bf16 %v671_v1, %v670_v0 }
 0x1e3   : > { %957 = vmatmul.mubr.msk.bf16.vlgmr.msra.gmra.mrb[4].mxu1 %vm625_vm1, %v672_v2 }
 0x2b6   : > { %v765_v4 = vpop.f32.mrb[4].mxu1 }
 0x2b7   : > { %v766_v5 = vadd.f32 %v881_v3, %v765_v4  ;;  %v958_v6 = vpop.f32.mrb[5].mxu1 }
 0x2b8   : > { %v768_v7 = vpop.f32.mrb[6].mxu1 }
 0x2b9   : > { %773 = vst.msk [vmem:[%s359_s12] sm:$0xff] %vm772_vm2, %v766_v5  ;;  %v769_v8 = vadd.f32 %v881_v3, %v768_v7  ;;  %v959_v9 = vpop.f32.mrb[7].mxu1 }
 0x2bb   : > { %774 = vst.msk [vmem:[%s359_s12 + $0x8] sm:$0xff] %vm772_vm2, %v769_v8 }
 0x2bc PF: > { %s19_s30 = sadd.s32 1, %s1006_s30  }
 0x2bd   : > { %p16_p4 = scmp.ge.s32.totalorder %s19_s30, 4  }
 0x2bf   :  { %18 = sbr.rel (!%p16_p4) target bundleno = 1 (0x1), region = 89 }

// kernel: closed_call.20
= control target key start
LH: loop header
LB: loop body
LE: loop exit
PB: predicated region body
PF: predicated region fallthrough
CT: control target
= control target key end

     0   :  { %s1443_s29 = smov 0   ;;  %s1625_s0 = inlined_call_operand.vmem [shape: f32[16,10], index: 0, kind: input, shape index: {}]   ;;  %s1626_s1 = inlined_call_operand.vmem [shape: f32[16,128], index: 1, kind: input, shape index: {}]   ;;  %s1627_s2 = inlined_call_operand.vmem [shape: f32[16,128], index: 2, kind: input, shape index: {}]   ;;  %s1628_s3 = inlined_call_operand.vmem [shape: f32[16,128], index: 3, kind: input, shape index: {}]   ;;  %s1629_s4 = inlined_call_operand.vmem [shape: f32[16,128], index: 4, kind: input, shape index: {}]   ;;  %s1630_s5 = inlined_call_operand.vmem [shape: bf16[10,128], index: 5, kind: input, shape index: {}]   ;;  %s1631_s6 = inlined_call_operand.vmem [shape: bf16[10,128], index: 6, kind: input, shape index: {}]   ;;  %s1632_s7 = inlined_call_operand.vmem [shape: bf16[10,128], index: 7, kind: input, shape index: {}]   ;;  %s1633_s8 = inlined_call_operand.vmem [shape: bf16[128,128], index: 8, kind: input, shape index: {}]   ;;  %s1634_s9 = inlined_call_operand.vmem [shape: bf16[128,128], index: 9, kind: input, shape index: {}]   ;;  %s1635_s10 = inlined_call_operand.vmem [shape: bf16[128,128], index: 10, kind: input, shape index: {}]   ;;  %s1636_s11 = inlined_call_operand.vmem [shape: f32[1,128], index: 11, kind: input, shape index: {}]   ;;  %s1637_s12 = inlined_call_operand.vmem [shape: f32[1,128], index: 12, kind: input, shape index: {}]   ;;  %s1638_s13 = inlined_call_operand.vmem [shape: f32[1,128], index: 13, kind: input, shape index: {}]   ;;  %s1639_s14 = inlined_call_operand.vmem [shape: f32[16,128], index: 14, kind: output, shape index: {}]  }
   0x1 LB: > { %s1152_s30 = sadd.s32 4294967295, %s1364_s29   ;;  %p1156_p0 = scmp.ge.s32.totalorder %s1364_s29, 1  ;;  %s1364_s29 = sphi %s1443_s29, %s24_s29  }
   0x2   : > { %p447_p1 = scmp.lt.s32.totalorder %s1364_s29, 3 }
   0x4   : > { %p448_p2 = pnand %p1156_p0, %p447_p1 }
   0x5   : > { %v1321_v0 = vld [vmem:[%s1633_s8] sm:$0xff] (!%p448_p2)   ;;  %v1366_v1 = vmov (!%p448_p2), 0.0   ;;  %vm548_vm0 = vcmask (!%p448_p2), 1044480   ;;  %v1323_v3 = vld [vmem:[%s1633_s8 + $0x8] sm:$0xff] (!%p448_p2)   ;;  %p507_p3 = scmp.lt.s32.totalorder (!%p448_p2), %s1152_s30, 1  ;;  %vm1367_vm1 = vmmov (!%p448_p2), 0  }
   0x6   : > { %451 = sbr.rel (%p448_p2) target bundleno = 308 (0x134), region = 76  ;;  %1239 = vmatprep.subr.bf16.mxu1 (!%p448_p2), %v1366_v1  ;;  %1233 = vmatprep.subr.bf16.mxu0 (!%p448_p2), %v1366_v1  ;;  %v1322_v2 = vld [vmem:[%s1630_s5] sm:$0x1f] (!%p448_p2)   ;;  %v1324_v5 = vld [vmem:[%s1633_s8 + $0x10] sm:$0xff] (!%p448_p2)   ;;  %vm544_vm2 = vcmask (!%p448_p2), 80896   ;;  %v1326_v10 = vld [vmem:[%s1633_s8 + $0x18] sm:$0xff] (!%p448_p2)  }
   0x7   : > { %1240 = vmatpush3.bf16.msra.mxu1 (!%p448_p2), %v1321_v0  ;;  %v550_v4 = vsel (!%p448_p2), %vm548_vm0, %v1322_v2, 0  ;;  %1235 = vmatprep.mubr.msk.bf16.mxu0 (!%p448_p2), %vm1367_vm1, %v1366_v1  ;;  %v1325_v6 = vld [vmem:[%s1631_s6] sm:$0x1f] (!%p448_p2)   ;;  %v1330_v13 = vld [vmem:[%s1633_s8 + $0x28] sm:$0xff] (!%p448_p2)   ;;  %v1332_v15 = vld [vmem:[%s1633_s8 + $0x30] sm:$0xff] (!%p448_p2)  }
   0x8   : > { %1241 = vmatprep.subr.bf16.mxu1 (!%p448_p2), %v1366_v1  ;;  %1234 = vmatpush3.bf16.msra.mxu0 (!%p448_p2), %v550_v4  ;;  %v720_v9 = vsel (!%p448_p2), %vm548_vm0, %v1325_v6, 0  ;;  %v1328_v11 = vld [vmem:[%s1633_s8 + $0x20] sm:$0xff] (!%p448_p2)   ;;  %v1329_v14 = vld [vmem:[%s1634_s9 + $0x8] sm:$0xff] (!%p448_p2)   ;;  %v1331_v16 = vld [vmem:[%s1634_s9 + $0x10] sm:$0xff] (!%p448_p2)  }
   0x9   : > { %1259 = vmatprep.subr.bf16.mxu0 (!%p448_p2), %v1366_v1  ;;  %1255 = vmatprep.mubr.msk.bf16.mxu1 (!%p448_p2), %vm1367_vm1, %v1366_v1  ;;  %v1327_v12 = vld [vmem:[%s1634_s9] sm:$0xff] (!%p448_p2)   ;;  %v1334_v17 = vld [vmem:[%s1633_s8 + $0x38] sm:$0xff] (!%p448_p2)   ;;  %v1338_v23 = vld [vmem:[%s1635_s10 + $0x8] sm:$0xff] (!%p448_p2)  }
   0xa   : > { %v1333_v19 = vld [vmem:[%s1634_s9 + $0x18] sm:$0xff] (!%p448_p2)   ;;  %v1336_v21 = vld [vmem:[%s1635_s10] sm:$0xff] (!%p448_p2)   ;;  %v1337_v24 = vld [vmem:[%s1634_s9 + $0x28] sm:$0xff] (!%p448_p2)  }
   0xb   : > { %1242 = vmatpush3.bf16.msra.mxu1 (!%p448_p2), %v1323_v3  ;;  %v1335_v22 = vld [vmem:[%s1634_s9 + $0x20] sm:$0xff] (!%p448_p2)   ;;  %v1340_v25 = vld [vmem:[%s1635_s10 + $0x10] sm:$0xff] (!%p448_p2)   ;;  %v1342_v27 = vld [vmem:[%s1635_s10 + $0x18] sm:$0xff] (!%p448_p2)  }
   0xc   : > { %1243 = vmatprep.subr.bf16.mxu1 (!%p448_p2), %v1366_v1  ;;  %v1339_v26 = vld [vmem:[%s1634_s9 + $0x30] sm:$0xff] (!%p448_p2)   ;;  %v1341_v28 = vld [vmem:[%s1634_s9 + $0x38] sm:$0xff] (!%p448_p2)   ;;  %v1343_v29 = vld [vmem:[%s1635_s10 + $0x20] sm:$0xff] (!%p448_p2)  }
   0xd   : > { %s1641_s30 = smov (!%p507_p3, %s1152_s30), 1  ;;  %v1346_v30 = vld [vmem:[%s1632_s7] sm:$0x1f]   ;;  %v1344_v31 = vld [vmem:[%s1635_s10 + $0x28] sm:$0xff]   ;;  %v1345_v33 = vld [vmem:[%s1635_s10 + $0x30] sm:$0xff]  }
   0xe   : > { %s1475_s25 = sshll.u32 %s1641_s30, 3  ;;  %v890_v32 = vsel %vm548_vm0, %v1346_v30, 0  ;;  %v1347_v34 = vld [vmem:[%s1635_s10 + $0x38] sm:$0xff]   ;;  %v1173_v46 = vld [vmem:[%s1636_s11] ss:$0 sm:$0xff] }
   0xf   : > { %s510_s28 = scalar_lea.vmem %s1625_s0, %s1475_s25  ;;  %1244 = vmatpush3.bf16.msra.mxu1 %v1324_v5  ;;  %s514_s15 = scalar_lea.vmem %s1626_s1, %s1475_s25  ;;  %v1185_v57 = vld [vmem:[%s1637_s12] ss:$0 sm:$0xff] }
  0x10   : > { %v532_v7 = vld [vmem:[%s510_s28] sm:$0xff]  ;;  %1245 = vmatprep.subr.bf16.mxu1 %v1366_v1  ;;  %s518_s21 = scalar_lea.vmem %s1627_s2, %s1475_s25  ;;  %s522_s27 = scalar_lea.vmem %s1628_s3, %s1475_s25 }
  0x11   : > { %v1482_v8 = vpack.c.bf16 %v532_v7, %v532_v7  ;;  %v1528_v18 = vld [vmem:[%s514_s15] sm:$0xff]  ;;  %s526_s17 = scalar_lea.vmem %s1629_s4, %s1475_s25  ;;  %s530_s22 = scalar_lea.vmem %s1639_s14, %s1475_s25 }
  0x12   : > { %v535_v20 = vpack.c.bf16 %v1528_v18, %v1528_v18  ;;  %v538_v43 = vld [vmem:[%s518_s21] sm:$0xff] }
  0x13   : > { %1236 = vmatmul.mubr.msk.bf16.vlgmr.msra.gmra.mrb[0].mxu0 %vm544_vm2, %v1482_v8  ;;  %1246 = vmatpush3.bf16.msra.mxu1 %v1326_v10  ;;  %v713_v53 = vld [vmem:[%s522_s27] sm:$0xff] }
  0x14   : > { %1260 = vmatpush3.bf16.msra.mxu0 %v720_v9  ;;  %1261 = vmatprep.mubr.msk.bf16.mxu0 %vm1367_vm1, %v1366_v1  ;;  %v883_v4 = vld [vmem:[%s526_s17] sm:$0xff] }
  0x15   : > { %1265 = vmatprep.subr.bf16.mxu0 %v1366_v1  ;;  %1247 = vmatprep.subr.bf16.mxu1 %v1366_v1  ;;  %v1189_v5 = vld [vmem:[%s1638_s13] ss:$0 sm:$0xff] }
  0x17   : > { %1248 = vmatpush3.bf16.msra.mxu1 %v1328_v11 }
  0x18   : > { %1249 = vmatprep.subr.bf16.mxu1 %v1366_v1 }
  0x1b   : > { %1262 = vmatmul.mubr.msk.bf16.vlgmr.msra.gmra.mrb[4].mxu0 %vm544_vm2, %v1482_v8  ;;  %1250 = vmatpush3.bf16.msra.mxu1 %v1330_v13 }
  0x1c   : > { %1266 = vmatpush3.bf16.msra.mxu0 %v1327_v12  ;;  %1281 = vmatprep.mubr.msk.bf16.mxu0 %vm1367_vm1, %v1366_v1 }
  0x1d   : > { %1267 = vmatprep.subr.bf16.mxu0 %v1366_v1  ;;  %1251 = vmatprep.subr.bf16.mxu1 %v1366_v1 }
  0x1f   : > { %1252 = vmatpush3.bf16.msra.mxu1 %v1332_v15 }
  0x20   : > { %1268 = vmatpush3.bf16.msra.mxu0 %v1329_v14  ;;  %1253 = vmatprep.subr.bf16.mxu1 %v1366_v1 }
  0x21   : > { %1269 = vmatprep.subr.bf16.mxu0 %v1366_v1 }
  0x23   : > { %1254 = vmatpush3.bf16.msra.mxu1 %v1334_v17 }
  0x24   : > { %1270 = vmatpush3.bf16.msra.mxu0 %v1331_v16  ;;  %1291 = vmatprep.subr.bf16.mxu1 %v1366_v1 }
  0x25   : > { %1271 = vmatprep.subr.bf16.mxu0 %v1366_v1 }
  0x26   : > { %1256 = vmatmul.mubr.bf16.vlgmr.msra.gmra.mrb[0].mxu1 %v535_v20 }
  0x27   : > { %1292 = vmatpush3.bf16.msra.mxu1 %v1336_v21  ;;  %1307 = vmatprep.mubr.msk.bf16.mxu1 %vm1367_vm1, %v1366_v1 }
  0x28   : > { %1272 = vmatpush3.bf16.msra.mxu0 %v1333_v19  ;;  %1293 = vmatprep.subr.bf16.mxu1 %v1366_v1 }
  0x29   : > { %1273 = vmatprep.subr.bf16.mxu0 %v1366_v1 }
  0x2b   : > { %1294 = vmatpush3.bf16.msra.mxu1 %v1338_v23 }
  0x2c   : > { %1274 = vmatpush3.bf16.msra.mxu0 %v1335_v22  ;;  %1295 = vmatprep.subr.bf16.mxu1 %v1366_v1 }
  0x2d   : > { %1275 = vmatprep.subr.bf16.mxu0 %v1366_v1 }
  0x2f   : > { %1296 = vmatpush3.bf16.msra.mxu1 %v1340_v25 }
  0x30   : > { %1276 = vmatpush3.bf16.msra.mxu0 %v1337_v24  ;;  %1297 = vmatprep.subr.bf16.mxu1 %v1366_v1 }
  0x31   : > { %1277 = vmatprep.subr.bf16.mxu0 %v1366_v1 }
  0x33   : > { %1298 = vmatpush3.bf16.msra.mxu1 %v1342_v27 }
  0x34   : > { %1278 = vmatpush3.bf16.msra.mxu0 %v1339_v26  ;;  %1299 = vmatprep.subr.bf16.mxu1 %v1366_v1 }
  0x35   : > { %1279 = vmatprep.subr.bf16.mxu0 %v1366_v1 }
  0x37   : > { %1300 = vmatpush3.bf16.msra.mxu1 %v1343_v29 }
  0x38   : > { %1280 = vmatpush3.bf16.msra.mxu0 %v1341_v28  ;;  %1301 = vmatprep.subr.bf16.mxu1 %v1366_v1 }
  0x39   : > { %1285 = vmatprep.subr.bf16.mxu0 %v1366_v1 }
  0x3b   : > { %1282 = vmatmul.mubr.bf16.vlgmr.msra.gmra.mrb[8].mxu0 %v535_v20  ;;  %1302 = vmatpush3.bf16.msra.mxu1 %v1344_v31 }
  0x3c   : > { %1286 = vmatpush3.bf16.msra.mxu0 %v890_v32  ;;  %1287 = vmatprep.mubr.msk.bf16.mxu0 %vm1367_vm1, %v1366_v1 }
  0x3d   : > { %1303 = vmatprep.subr.bf16.mxu1 %v1366_v1 }
  0x3f   : > { %1304 = vmatpush3.bf16.msra.mxu1 %v1345_v33 }
  0x40   : > { %1305 = vmatprep.subr.bf16.mxu1 %v1366_v1 }
  0x43   : > { %1288 = vmatmul.mubr.msk.bf16.vlgmr.msra.gmra.mrb[12].mxu0 %vm544_vm2, %v1482_v8  ;;  %1306 = vmatpush3.bf16.msra.mxu1 %v1347_v34 }
  0x46   : > { %1308 = vmatmul.mubr.bf16.vlgmr.msra.gmra.mrb[4].mxu1 %v535_v20 }
  0xe6   : > { %v586_v35 = vpop.f32.mrb[0].mxu0 }
  0xe7   : > { %v1237_v36 = vpop.f32.mrb[1].mxu0  ;;  %v587_v44 = vadd.f32 %v586_v35, %v538_v43 }
  0xe8   : > { %v589_v37 = vpop.f32.mrb[2].mxu0 }
  0xe9   : > { %v1238_v38 = vpop.f32.mrb[3].mxu0 }
  0xee   : > { %v756_v39 = vpop.f32.mrb[4].mxu0 }
  0xef   : > { %v1263_v40 = vpop.f32.mrb[5].mxu0  ;;  %v757_v55 = vadd.f32 %v756_v39, %v713_v53 }
  0xf0   : > { %v759_v41 = vpop.f32.mrb[6].mxu0 }
  0xf1   : > { %v1264_v42 = vpop.f32.mrb[7].mxu0 }
  0xf9   : > { %v690_v45 = vpop.f32.mrb[0].mxu1 }
  0xfa   : > { %v696_v47 = vadd.f32 %v690_v45, %v587_v44  ;;  %v1257_v48 = vpop.f32.mrb[1].mxu1 }
  0xfb   : > { %v693_v49 = vpop.f32.mrb[2].mxu1 }
  0xfc   : > { %v704_v50 = vadd.f32 %v1173_v46, %v696_v47  ;;  %v1258_v51 = vpop.f32.mrb[3].mxu1 }
  0xfe   : > { %v1174_v52 = vmul.f32 -1.442695, %v704_v50 }
 0x100   : > { %1348 = vpow2.f32 %v1174_v52 }
 0x10a   : > { %v1349_v54 = vpop.eup %1348 }
 0x10b   : > { %v708_v58 = vadd.f32 1.0, %v1349_v54 }
 0x10d   : > { %1350 = vrcp.f32 %v708_v58 }
 0x10e   : > { %v860_v56 = vpop.f32.mrb[8].mxu0 }
 0x10f   : > { %v866_v59 = vadd.f32 %v860_v56, %v757_v55  ;;  %v1283_v60 = vpop.f32.mrb[9].mxu0 }
 0x110   : > { %v863_v61 = vpop.f32.mrb[10].mxu0 }
 0x111   : > { %v874_v62 = vadd.f32 %v1185_v57, %v866_v59  ;;  %v1284_v63 = vpop.f32.mrb[11].mxu0 }
 0x113   : > { %v1186_v0 = vmul.f32 -1.442695, %v874_v62 }
 0x115   : > { %1352 = vpow2.f32 %v1186_v0 }
 0x116   : > { %v926_v1 = vpop.f32.mrb[12].mxu0 }
 0x117   : > { %v1289_v2 = vpop.f32.mrb[13].mxu0  ;;  %v927_v8 = vadd.f32 %v926_v1, %v883_v4  ;;  %v1351_v11 = vpop.eup %1350 }
 0x118   : > { %v929_v3 = vpop.f32.mrb[14].mxu0 }
 0x119   : > { %v1290_v6 = vpop.f32.mrb[15].mxu0  ;;  %v1037_v7 = vpop.f32.mrb[4].mxu1 }
 0x11a   : > { %v1038_v9 = vadd.f32 %v1189_v5, %v1037_v7  ;;  %v1309_v10 = vpop.f32.mrb[5].mxu1 }
 0x11b   : > { %v1040_v12 = vpop.f32.mrb[6].mxu1 }
 0x11c   : > { %v1043_v13 = vmul.f32 %v1351_v11, %v1038_v9  ;;  %v1310_v14 = vpop.f32.mrb[7].mxu1 }
 0x11e   : > { %v1044_v17 = vadd.f32 %v1043_v13, %v927_v8 }
 0x11f   : > { %v1353_v15 = vpop.eup %1352 }
 0x120   : > { %v878_v16 = vadd.f32 1.0, %v1353_v15 }
 0x122   : > { %1354 = vrcp.f32 %v878_v16 }
 0x123   : > { %1356 = vtanh.f32 %v1044_v17 }
 0x12c   : > { %v1355_v19 = vpop.eup %1354 }
 0x12d   : > { %v1357_v20 = vpop.eup %1356  ;;  %v1046_v21 = vsub.f32 1.0, %v1355_v19  ;;  %v1048_v22 = vmul.f32 %v1355_v19, %v1528_v18 }
 0x12f   : > { %v1047_v23 = vmul.f32 %v1357_v20, %v1046_v21 }
 0x131   : > { %v1049_v24 = vadd.f32 %v1048_v22, %v1047_v23 }
 0x133   : > { %1050 = vst [vmem:[%s530_s22] sm:$0xff] %v1049_v24 }
 0x134 PF: > { %s24_s29 = sadd.s32 1, %s1364_s29  }
 0x135   : > { %p21_p4 = scmp.ge.s32.totalorder %s24_s29, 4  }
 0x137   :  { %23 = sbr.rel (!%p21_p4) target bundleno = 1 (0x1), region = 118 }

// kernel: closed_call.21
= control target key start
LH: loop header
LB: loop body
LE: loop exit
PB: predicated region body
PF: predicated region fallthrough
CT: control target
= control target key end

     0   :  { %s2958_s0 = inlined_call_operand.vmem [shape: f32[32,256], index: 0, kind: input, shape index: {}]   ;;  %s2959_s1 = inlined_call_operand.vmem [shape: f32[32,1], index: 1, kind: input, shape index: {}]   ;;  %s2960_s2 = inlined_call_operand.vmem [shape: f32[32,66], index: 2, kind: input, shape index: {}]   ;;  %s2961_s3 = inlined_call_operand.vmem [shape: bf16[256,64], index: 3, kind: input, shape index: {}]   ;;  %s2962_s4 = inlined_call_operand.vmem [shape: bf16[256,64], index: 4, kind: input, shape index: {}]   ;;  %s2963_s5 = inlined_call_operand.vmem [shape: bf16[256,64], index: 5, kind: input, shape index: {}]   ;;  %s2964_s6 = inlined_call_operand.vmem [shape: f32[1,64], index: 6, kind: input, shape index: {}]   ;;  %s2965_s7 = inlined_call_operand.vmem [shape: f32[1,64], index: 7, kind: input, shape index: {}]   ;;  %s2966_s8 = inlined_call_operand.vmem [shape: f32[1,64], index: 8, kind: input, shape index: {}]   ;;  %s2967_s9 = inlined_call_operand.vmem [shape: f32[1,64], index: 9, kind: input, shape index: {}]   ;;  %s2968_s10 = inlined_call_operand.vmem [shape: f32[1,64], index: 10, kind: input, shape index: {}]   ;;  %s2969_s11 = inlined_call_operand.vmem [shape: f32[1,64], index: 11, kind: input, shape index: {}]   ;;  %s2970_s12 = inlined_call_operand.vmem [shape: bf16[64,64], index: 12, kind: input, shape index: {}]   ;;  %s2971_s13 = inlined_call_operand.vmem [shape: bf16[64,64], index: 13, kind: input, shape index: {}]   ;;  %s2972_s14 = inlined_call_operand.vmem [shape: bf16[64,64], index: 14, kind: input, shape index: {}]   ;;  %s2973_s15 = inlined_call_operand.vmem [shape: f32[1,64], index: 15, kind: input, shape index: {}]   ;;  %s2974_s16 = inlined_call_operand.vmem [shape: f32[1,64], index: 16, kind: input, shape index: {}]   ;;  %s2975_s17 = inlined_call_operand.vmem [shape: f32[1,64], index: 17, kind: input, shape index: {}]   ;;  %s2976_s18 = inlined_call_operand.vmem [shape: bf16[64,96], index: 18, kind: input, shape index: {}]   ;;  %s2977_s19 = inlined_call_operand.vmem [shape: f32[1,96], index: 19, kind: input, shape index: {}]   ;;  %s2978_s20 = inlined_call_operand.vmem [shape: bf16[96,96], index: 20, kind: input, shape index: {}]   ;;  %s2979_s21 = inlined_call_operand.vmem [shape: f32[1,96], index: 21, kind: input, shape index: {}]   ;;  %s2980_s22 = inlined_call_operand.vmem [shape: bf16[96,2], index: 22, kind: input, shape index: {}]   ;;  %s2981_s23 = inlined_call_operand.vmem [shape: f32[1,2], index: 23, kind: input, shape index: {}]   ;;  %s2982_s24 = inlined_call_operand.vmem [shape: f32[32,66], index: 24, kind: output, shape index: {}]  }
   0x1   :  { %2987 = sst [smem:[#allocation3_spill]] %s2958_s0 }
   0x2   :  { %2988 = sst [smem:[#allocation4_spill]] %s2959_s1 }
   0x3   :  { %2989 = sst [smem:[#allocation5_spill]] %s2960_s2 }
   0x4   :  { %2990 = sst [smem:[#allocation6_spill]] %s2961_s3 }
   0x5   :  { %2991 = sst [smem:[#allocation7_spill]] %s2962_s4 }
   0x6   :  { %2992 = sst [smem:[#allocation8_spill]] %s2963_s5  ;;  %s2580_s5 = smov 0  }
   0x7   :  { %2993 = sst [smem:[#allocation9_spill]] %s2964_s6 }
   0x8   :  { %2994 = sst [smem:[#allocation10_spill]] %s2965_s7 }
   0x9   :  { %2995 = sst [smem:[#allocation11_spill]] %s2966_s8 }
   0xa   :  { %2996 = sst [smem:[#allocation12_spill]] %s2970_s12 }
   0xb LB: > { %2997 = sst [smem:[#allocation2_spill]] %s2449_s5  ;;  %s2039_s26 = sadd.s32 4294967295, %s2449_s5   ;;  %s2449_s5 = sphi %s2580_s5, %s34_s5  }
   0xc   : > { %p2043_p0 = scmp.ge.s32.totalorder %s2449_s5, 1  ;;  %p686_p1 = scmp.lt.s32.totalorder %s2449_s5, 3 }
   0xe   : > { %p687_p2 = pnand %p2043_p0, %p686_p1 }
   0xf   : > { %s2998_s6 = sld [smem:[#allocation6_spill]] (!%p687_p2)  ;;  %v2451_v1 = vmov (!%p687_p2), 0.0   ;;  %s2999_s12 = sld [smem:[#allocation12_spill]] (!%p687_p2)  ;;  %vm2452_vm0 = vmmov (!%p687_p2), 0   ;;  %v2453_v9 = vmov (!%p687_p2), 0   ;;  %vm1036_vm1 = vcmask (!%p687_p2), 523264  }
  0x10   : > { %690 = sbr.rel (%p687_p2) target bundleno = 1117 (0x45d), region = 116  ;;  %2254 = vmatprep.subr.bf16.mxu1 (!%p687_p2), %v2451_v1  ;;  %2262 = vmatprep.mubr.msk.bf16.mxu1 (!%p687_p2), %vm2452_vm0, %v2451_v1  ;;  %s2044_s30 = sshll.u32 (!%p687_p2), %s2039_s26, 1  ;;  %v2377_v41 = vld [vmem:[%s2971_s13] sm:$0xff] (!%p687_p2)   ;;  %v2380_v44 = vld [vmem:[%s2971_s13 + $0x8] sm:$0xff] (!%p687_p2)   ;;  %v2383_v47 = vld [vmem:[%s2971_s13 + $0x10] sm:$0xff] (!%p687_p2)   ;;  %vm1799_vm2 = vcmask (!%p687_p2), 785408  }
  0x11   : > { %p764_p3 = scmp.lt.s32.totalorder (!%p687_p2), %s2044_s30, 3  ;;  %2346 = vset.pattern.permute.xlu0 (!%p687_p2), %v2453_v9  ;;  %s3000_s29 = sld [smem:[#allocation5_spill]] (!%p687_p2)  ;;  %v2386_v50 = vld [vmem:[%s2971_s13 + $0x18] sm:$0xff] (!%p687_p2)   ;;  %v2389_v52 = vld [vmem:[%s2972_s14] sm:$0xff] (!%p687_p2)   ;;  %v2392_v55 = vld [vmem:[%s2972_s14 + $0x8] sm:$0xff] (!%p687_p2)   ;;  %vm1956_vm3 = vcmask (!%p687_p2), 540160  }
  0x12   : > { %s3001_s25 = sld [smem:[#allocation7_spill]] (!%p687_p2)  ;;  %s3002_s26 = sld [smem:[#allocation3_spill]] (!%p687_p2)  ;;  %v2395_v58 = vld [vmem:[%s2972_s14 + $0x10] sm:$0xff] (!%p687_p2)   ;;  %v2398_v61 = vld [vmem:[%s2972_s14 + $0x18] sm:$0xff] (!%p687_p2)  }
  0x13   : > { %s3004_s7 = sld [smem:[#allocation4_spill]] (!%p687_p2)  ;;  %s3007_s5 = sld [smem:[#allocation11_spill]] (!%p687_p2) }
  0x15   : > { %v2347_v0 = vld [vmem:[%s2998_s6 + $0x40] sm:$0xff] (!%p687_p2)   ;;  %v2350_v4 = vld [vmem:[%s2998_s6 + $0x48] sm:$0xff] (!%p687_p2)   ;;  %v2353_v7 = vld [vmem:[%s2998_s6 + $0x50] sm:$0xff] (!%p687_p2)  }
  0x16   : > { %v2348_v2 = vld [vmem:[%s2999_s12] sm:$0xff] (!%p687_p2)   ;;  %2154 = vmatprep.subr.bf16.mxu0 (!%p687_p2), %v2347_v0  ;;  %v2351_v5 = vld [vmem:[%s2999_s12 + $0x8] sm:$0xff] (!%p687_p2)   ;;  %v2354_v8 = vld [vmem:[%s2999_s12 + $0x10] sm:$0xff] (!%p687_p2)  }
  0x17   : > { %v2349_v3 = vld [vmem:[%s2998_s6] sm:$0xff]   ;;  %2255 = vmatpush3.bf16.msra.mxu1 %v2348_v2  ;;  %v2352_v6 = vld [vmem:[%s2998_s6 + $0x8] sm:$0xff]   ;;  %s3010_s30 = smov (!%p764_p3, %s2044_s30), 3  ;;  %v2355_v10 = vld [vmem:[%s2998_s6 + $0x10] sm:$0xff]  }
  0x18   : > { %2155 = vmatpush3.bf16.msra.mxu0 %v2349_v3  ;;  %2256 = vmatprep.subr.bf16.mxu1 %v2451_v1  ;;  %s2623_s3 = sshll.u32 %s3010_s30, 3  ;;  %v2356_v11 = vld [vmem:[%s2998_s6 + $0x58] sm:$0xff]   ;;  %v2359_v14 = vld [vmem:[%s3001_s25 + $0x40] sm:$0xff]   ;;  %v2363_v21 = vld [vmem:[%s3001_s25 + $0x48] sm:$0xff]   ;;  %s2153_s2 = sshll.u32 %s3010_s30, 4 }
  0x19   : > { %2156 = vmatprep.subr.bf16.mxu0 %v2350_v4  ;;  %v2357_v12 = vld [vmem:[%s2999_s12 + $0x18] sm:$0xff]   ;;  %s780_s0 = scalar_lea.vmem %s3000_s29, %s2623_s3  ;;  %v2360_v15 = vld [vmem:[%s2998_s6 + $0x60] sm:$0xff]   ;;  %v2364_v22 = vld [vmem:[%s2998_s6 + $0x68] sm:$0xff]   ;;  %s768_s30 = scalar_lea.vmem %s3002_s26, %s2153_s2 }
  0x1a   : > { %v2358_v13 = vld [vmem:[%s2998_s6 + $0x18] sm:$0xff]   ;;  %v2645_v16 = vld [vmem:[%s780_s0] sm:$0xff]  ;;  %v2647_v17 = vld [vmem:[%s780_s0 + $0x8] sm:$0xff]  ;;  %s3003_s2 = sld [smem:[#allocation8_spill]]  ;;  %s774_s8 = scalar_lea.vmem %s3004_s7, %s2623_s3 }
  0x1b   : > { %2257 = vmatpush3.bf16.msra.mxu1 %v2351_v5  ;;  %v2651_v18 = vpack.c.bf16 %v2647_v17, %v2645_v16  ;;  %v2361_v19 = vld [vmem:[%s3001_s25] sm:$0xff]   ;;  %v2365_v23 = vld [vmem:[%s3001_s25 + $0x8] sm:$0xff]   ;;  %v2367_v25 = vld [vmem:[%s3001_s25 + $0x50] sm:$0xff]   ;;  %s2902_s0 = scalar_lea.vmem %s2982_s24, %s2623_s3 }
  0x1c   : > { %2157 = vmatpush3.bf16.msra.mxu0 %v2352_v6  ;;  %2258 = vmatprep.subr.bf16.mxu1 %v2451_v1  ;;  %v2362_v20 = vld [vmem:[%s2998_s6 + $0x20] sm:$0xff]   ;;  %v2366_v24 = vld [vmem:[%s2998_s6 + $0x28] sm:$0xff]   ;;  %v2368_v26 = vld [vmem:[%s2998_s6 + $0x70] sm:$0xff]  }
  0x1d   : > { %2158 = vmatprep.subr.bf16.mxu0 %v2353_v7  ;;  %v2369_v27 = vld [vmem:[%s3001_s25 + $0x10] sm:$0xff]   ;;  %v2371_v29 = vld [vmem:[%s3001_s25 + $0x58] sm:$0xff]   ;;  %v790_v33 = vld [vmem:[%s768_s30 + $0x8] sm:$0xff] }
  0x1e   : > { %v2370_v28 = vld [vmem:[%s2998_s6 + $0x30] sm:$0xff]   ;;  %v2372_v30 = vld [vmem:[%s2998_s6 + $0x78] sm:$0xff]   ;;  %v2375_v36 = vld [vmem:[%s3001_s25 + $0x60] sm:$0xff]  }
  0x1f   : > { %2259 = vmatpush3.bf16.msra.mxu1 %v2354_v8  ;;  %v2373_v31 = vld [vmem:[%s3001_s25 + $0x18] sm:$0xff]   ;;  %v789_v37 = vld [vmem:[%s768_s30] sm:$0xff]  ;;  %v791_v38 = vld [vmem:[%s768_s30 + $0x10] sm:$0xff] }
  0x20   : > { %2159 = vmatpush3.bf16.msra.mxu0 %v2355_v10  ;;  %2260 = vmatprep.subr.bf16.mxu1 %v2451_v1  ;;  %v2374_v32 = vld [vmem:[%s2998_s6 + $0x38] sm:$0xff]   ;;  %v2704_v39 = vpack.c.bf16 %v791_v38, %v789_v37  ;;  %v2376_v40 = vld [vmem:[%s3001_s25 + $0x20] sm:$0xff]   ;;  %v2378_v42 = vld [vmem:[%s3001_s25 + $0x68] sm:$0xff]  }
  0x21   : > { %2160 = vmatprep.subr.bf16.mxu0 %v2356_v11  ;;  %v792_v34 = vld [vmem:[%s768_s30 + $0x18] sm:$0xff]  ;;  %v2379_v43 = vld [vmem:[%s3001_s25 + $0x28] sm:$0xff]   ;;  %v2381_v45 = vld [vmem:[%s3001_s25 + $0x70] sm:$0xff]   ;;  %s3006_s30 = sld [smem:[#allocation10_spill]] }
  0x22   : > { %v794_v35 = vpack.c.bf16 %v792_v34, %v790_v33  ;;  %v2382_v46 = vld [vmem:[%s3001_s25 + $0x30] sm:$0xff]   ;;  %v2384_v48 = vld [vmem:[%s3001_s25 + $0x78] sm:$0xff]   ;;  %v2387_v51 = vld [vmem:[%s3003_s2 + $0x40] sm:$0xff]  }
  0x23   : > { %2261 = vmatpush3.bf16.msra.mxu1 %v2357_v12  ;;  %v2385_v49 = vld [vmem:[%s3001_s25 + $0x38] sm:$0xff]   ;;  %v2388_v53 = vld [vmem:[%s3003_s2] sm:$0xff]   ;;  %v2390_v54 = vld [vmem:[%s3003_s2 + $0x48] sm:$0xff]  }
  0x24   : > { %2161 = vmatpush3.bf16.msra.mxu0 %v2358_v13  ;;  %2181 = vmatprep.subr.bf16.mxu1 %v2359_v14  ;;  %v2391_v56 = vld [vmem:[%s3003_s2 + $0x8] sm:$0xff]   ;;  %v2393_v57 = vld [vmem:[%s3003_s2 + $0x50] sm:$0xff]   ;;  %v2396_v60 = vld [vmem:[%s3003_s2 + $0x58] sm:$0xff]  }
  0x25   : > { %2162 = vmatprep.subr.bf16.mxu0 %v2360_v15  ;;  %979 = vmatprep.mubr.bf16.mxu0 %v794_v35  ;;  %v2394_v59 = vld [vmem:[%s3003_s2 + $0x10] sm:$0xff]   ;;  %v2397_v62 = vld [vmem:[%s3003_s2 + $0x18] sm:$0xff]   ;;  %v2399_v63 = vld [vmem:[%s3003_s2 + $0x60] sm:$0xff]  }
  0x26   : > { %2263 = vmatmul.mubr.msk.bf16.vlgmr.msra.gmra.mrb[0].mxu1 %vm1036_vm1, %v2651_v18  ;;  %v2400_v0 = vld [vmem:[%s3003_s2 + $0x20] sm:$0xff]   ;;  %v796_v3 = vld [vmem:[%s774_s8 + $0x8] sm:$0xff]  ;;  %v2403_v6 = vld [vmem:[%s3003_s2 + $0x70] sm:$0xff]  }
  0x27   : > { %2182 = vmatpush3.bf16.msra.mxu1 %v2361_v19  ;;  %1264 = vmatprep.mubr.bf16.mxu1 %v794_v35  ;;  %v795_v2 = vld [vmem:[%s774_s8] sm:$0xff]  ;;  %v2401_v4 = vld [vmem:[%s3003_s2 + $0x68] sm:$0xff]   ;;  %v2404_v7 = vld [vmem:[%s3003_s2 + $0x30] sm:$0xff]   ;;  %s3005_s8 = sld [smem:[#allocation9_spill]] }
  0x28   : > { %2163 = vmatpush3.bf16.msra.mxu0 %v2362_v20  ;;  %2183 = vmatprep.subr.bf16.mxu1 %v2363_v21  ;;  %v2402_v5 = vld [vmem:[%s3003_s2 + $0x28] sm:$0xff]   ;;  %v2405_v8 = vld [vmem:[%s3003_s2 + $0x78] sm:$0xff]   ;;  %v2407_v10 = vld [vmem:[%s2976_s18] sm:$0xff]  }
  0x29   : > { %2164 = vmatprep.subr.bf16.mxu0 %v2364_v22  ;;  %835 = vperm.xlu0 %2346, %v795_v2   ;;  %v2406_v9 = vld [vmem:[%s3003_s2 + $0x38] sm:$0xff]   ;;  %v2408_v11 = vld [vmem:[%s2976_s18 + $0x8] sm:$0xff]   ;;  %v2409_v12 = vld [vmem:[%s2976_s18 + $0x10] sm:$0xff]  }
  0x2a   : > { %v2410_v13 = vld [vmem:[%s2976_s18 + $0x18] sm:$0xff]   ;;  %v2411_v14 = vld [vmem:[%s2978_s20] sm:$0xff]   ;;  %v2412_v15 = vld [vmem:[%s2978_s20 + $0x8] sm:$0xff]  }
  0x2b   : > { %2184 = vmatpush3.bf16.msra.mxu1 %v2365_v23  ;;  %v2414_v19 = vld [vmem:[%s2978_s20 + $0x18] sm:$0xff]   ;;  %v2071_v33 = vld [vmem:[%s2973_s15] ss:$0 sm:$0xff] }
  0x2c   : > { %2165 = vmatpush3.bf16.msra.mxu0 %v2366_v24  ;;  %2185 = vmatprep.subr.bf16.mxu1 %v2367_v25  ;;  %v2070_v34 = vld [vmem:[%s2967_s9] ss:$0 sm:$0xff] }
  0x2d   : > { %2166 = vmatprep.subr.bf16.mxu0 %v2368_v26  ;;  %840 = vperm.xlu0 %2346, %v796_v3   ;;  %v2053_v25 = vld [vmem:[%s3005_s8] ss:$0 sm:$0xff] }
  0x2f   : > { %2186 = vmatpush3.bf16.msra.mxu1 %v2369_v27 }
  0x30   : > { %2167 = vmatpush3.bf16.msra.mxu0 %v2370_v28  ;;  %2187 = vmatprep.subr.bf16.mxu1 %v2371_v29 }
  0x31   : > { %2168 = vmatprep.subr.bf16.mxu0 %v2372_v30 }
  0x33   : > { %2188 = vmatpush3.bf16.msra.mxu1 %v2373_v31 }
  0x34   : > { %2169 = vmatpush3.bf16.msra.mxu0 %v2374_v32  ;;  %2189 = vmatprep.subr.bf16.mxu1 %v2375_v36 }
  0x35   : > { %2266 = vmatprep.subr.bf16.mxu0 %v2451_v1 }
  0x37   : > { %980 = vmatmul.mubr.bf16.vlgmr.msra.gmra.mrb[0].mxu0 %v2704_v39  ;;  %2190 = vmatpush3.bf16.msra.mxu1 %v2376_v40 }
  0x38   : > { %2267 = vmatpush3.bf16.msra.mxu0 %v2377_v41  ;;  %2191 = vmatprep.subr.bf16.mxu1 %v2378_v42 }
  0x39   : > { %2268 = vmatprep.subr.bf16.mxu0 %v2451_v1  ;;  %2274 = vmatprep.mubr.msk.bf16.mxu0 %vm2452_vm0, %v2451_v1 }
  0x3b   : > { %2192 = vmatpush3.bf16.msra.mxu1 %v2379_v43 }
  0x3c   : > { %2269 = vmatpush3.bf16.msra.mxu0 %v2380_v44  ;;  %2193 = vmatprep.subr.bf16.mxu1 %v2381_v45 }
  0x3d   : > { %2270 = vmatprep.subr.bf16.mxu0 %v2451_v1 }
  0x3f   : > { %2194 = vmatpush3.bf16.msra.mxu1 %v2382_v46  ;;  %v2079_v46 = vld [vmem:[%s3006_s30] ss:$0 sm:$0xff]  ;;  %s2454_s30 = smov 64  }
  0x40   : > { %2271 = vmatpush3.bf16.msra.mxu0 %v2383_v47  ;;  %2195 = vmatprep.subr.bf16.mxu1 %v2384_v48 }
  0x41   : > { %2272 = vmatprep.subr.bf16.mxu0 %v2451_v1 }
  0x43   : > { %2196 = vmatpush3.bf16.msra.mxu1 %v2385_v49 }
  0x44   : > { %2273 = vmatpush3.bf16.msra.mxu0 %v2386_v50  ;;  %2278 = vmatprep.subr.bf16.mxu1 %v2451_v1 }
  0x45   : > { %2208 = vmatprep.subr.bf16.mxu0 %v2387_v51 }
  0x46   : > { %1265 = vmatmul.mubr.bf16.vlgmr.msra.gmra.mrb[4].mxu1 %v2704_v39 }
  0x47   : > { %2275 = vmatmul.mubr.msk.bf16.vlgmr.msra.gmra.mrb[4].mxu0 %vm1036_vm1, %v2651_v18  ;;  %2279 = vmatpush3.bf16.msra.mxu1 %v2389_v52 }
  0x48   : > { %2209 = vmatpush3.bf16.msra.mxu0 %v2388_v53  ;;  %2280 = vmatprep.subr.bf16.mxu1 %v2451_v1 }
  0x49   : > { %2210 = vmatprep.subr.bf16.mxu0 %v2390_v54  ;;  %2286 = vmatprep.mubr.msk.bf16.mxu1 %vm2452_vm0, %v2451_v1 }
  0x4a   : > { %1545 = vmatprep.mubr.bf16.mxu0 %v794_v35 }
  0x4b   : > { %2281 = vmatpush3.bf16.msra.mxu1 %v2392_v55 }
  0x4c   : > { %2211 = vmatpush3.bf16.msra.mxu0 %v2391_v56  ;;  %2282 = vmatprep.subr.bf16.mxu1 %v2451_v1  ;;  %v2096_v56 = vld [vmem:[%s2968_s10] ss:$0 sm:$0xff] }
  0x4d   : > { %2212 = vmatprep.subr.bf16.mxu0 %v2393_v57  ;;  %v2097_v57 = vld [vmem:[%s2974_s16] ss:$0 sm:$0xff] }
  0x4f   : > { %2283 = vmatpush3.bf16.msra.mxu1 %v2395_v58 }
  0x50   : > { %2213 = vmatpush3.bf16.msra.mxu0 %v2394_v59  ;;  %2284 = vmatprep.subr.bf16.mxu1 %v2451_v1 }
  0x51   : > { %2214 = vmatprep.subr.bf16.mxu0 %v2396_v60 }
  0x53   : > { %2285 = vmatpush3.bf16.msra.mxu1 %v2398_v61 }
  0x54   : > { %2215 = vmatpush3.bf16.msra.mxu0 %v2397_v62  ;;  %2290 = vmatprep.subr.bf16.mxu1 %v2451_v1 }
  0x55   : > { %2216 = vmatprep.subr.bf16.mxu0 %v2399_v63 }
  0x56   : > { %2287 = vmatmul.mubr.msk.bf16.vlgmr.msra.gmra.mrb[8].mxu1 %vm1036_vm1, %v2651_v18  ;;  %v2413_v18 = vld [vmem:[%s2978_s20 + $0x10] sm:$0xff]  }
  0x57   : > { %2298 = vmatprep.mubr.msk.bf16.mxu1 %vm2452_vm0, %v2451_v1  ;;  %2291 = vmatpush3.bf16.msra.mxu1 %v2407_v10 }
  0x58   : > { %2217 = vmatpush3.bf16.msra.mxu0 %v2400_v0  ;;  %2292 = vmatprep.subr.bf16.mxu1 %v2451_v1 }
  0x59   : > { %2218 = vmatprep.subr.bf16.mxu0 %v2401_v4 }
  0x5b   : > { %2293 = vmatpush3.bf16.msra.mxu1 %v2408_v11  ;;  %v2123_v11 = vld [vmem:[%s2975_s17] ss:$0 sm:$0xff] }
  0x5c   : > { %2219 = vmatpush3.bf16.msra.mxu0 %v2402_v5  ;;  %2294 = vmatprep.subr.bf16.mxu1 %v2451_v1 }
  0x5d   : > { %2220 = vmatprep.subr.bf16.mxu0 %v2403_v6 }
  0x5f   : > { %2295 = vmatpush3.bf16.msra.mxu1 %v2409_v12 }
  0x60   : > { %2221 = vmatpush3.bf16.msra.mxu0 %v2404_v7  ;;  %2296 = vmatprep.subr.bf16.mxu1 %v2451_v1 }
  0x61   : > { %2222 = vmatprep.subr.bf16.mxu0 %v2405_v8 }
  0x63   : > { %2297 = vmatpush3.bf16.msra.mxu1 %v2410_v13 }
  0x64   : > { %2223 = vmatpush3.bf16.msra.mxu0 %v2406_v9  ;;  %2318 = vmatprep.subr.bf16.mxu1 %v2451_v1 }
  0x65   : > { %2302 = vmatprep.subr.bf16.mxu0 %v2451_v1 }
  0x67   : > { %1546 = vmatmul.mubr.bf16.vlgmr.msra.gmra.mrb[8].mxu0 %v2704_v39 }
  0x68   : > { %2314 = vmatprep.mubr.msk.bf16.mxu0 %vm2452_vm0, %v2451_v1  ;;  %2303 = vmatpush3.bf16.msra.mxu0 %v2411_v14 }
  0x69   : > { %2304 = vmatprep.subr.bf16.mxu0 %v2451_v1 }
  0x6c   : > { %2305 = vmatpush3.bf16.msra.mxu0 %v2412_v15 }
  0x6d   : > { %2306 = vmatprep.subr.bf16.mxu0 %v2451_v1 }
  0x70   : > { %2307 = vmatpush3.bf16.msra.mxu0 %v2413_v18 }
  0x71   : > { %2308 = vmatprep.subr.bf16.mxu0 %v2451_v1 }
  0x74   : > { %2309 = vmatpush3.bf16.msra.mxu0 %v2414_v19 }
  0x75   : > { %2310 = vmatprep.subr.bf16.mxu0 %v2451_v1 }
  0xa8   : > { %v2860_v24 = vpop.permute.xlu0 %835 }
  0xa9   : > { %v849_v28 = vmul.f32 %v2053_v25, %v2860_v24  ;;  %v1134_v48 = vmul.f32 %v2079_v46, %v2860_v24 }
  0xac   : > { %v2865_v26 = vpop.permute.xlu0 %840 }
  0xad   : > { %v850_v32 = vmul.f32 %v2053_v25, %v2865_v26  ;;  %v1135_v52 = vmul.f32 %v2079_v46, %v2865_v26 }
  0xf9   : > { %v1074_v20 = vpop.f32.mrb[0].mxu1 }
  0xfa   : > { %v2264_v21 = vpop.f32.mrb[1].mxu1  ;;  %v1075_v38 = vadd.f32 %v2071_v33, %v1074_v20 }
  0xfb   : > { %v1077_v22 = vpop.f32.mrb[2].mxu1 }
  0xfc   : > { %v2265_v23 = vpop.f32.mrb[3].mxu1  ;;  %v1078_v41 = vadd.f32 %v2071_v33, %v1077_v22 }
 0x10a   : > { %v2170_v27 = vpop.f32.mrb[0].mxu0 }
 0x10b   : > { %v2171_v29 = vpop.f32.mrb[1].mxu0 }
 0x10c   : > { %v2172_v30 = vadd.f32 %v2171_v29, %v2170_v27  ;;  %v2173_v31 = vpop.f32.mrb[2].mxu0  ;;  %v2105_v29 = vld [vmem:[%s3007_s5] ss:$0 sm:$0xff] }
 0x10d   : > { %v2174_v35 = vpop.f32.mrb[3].mxu0  ;;  %v1415_v33 = vmul.f32 %v2105_v29, %v2860_v24 }
 0x10e   : > { %v982_v36 = vadd.f32 %v2172_v30, %v849_v28  ;;  %v2175_v37 = vadd.f32 %v2174_v35, %v2173_v31 }
 0x110   : > { %v995_v39 = vadd.f32 %v2070_v34, %v982_v36  ;;  %v985_v40 = vadd.f32 %v2175_v37, %v850_v32  ;;  %v2122_v37 = vld [vmem:[%s2969_s11] ss:$0 sm:$0xff] }
 0x112   : > { %v1081_v42 = vadd.f32 %v1075_v38, %v995_v39  ;;  %v996_v43 = vadd.f32 %v2070_v34, %v985_v40  ;;  %v1416_v39 = vmul.f32 %v2105_v29, %v2865_v26 }
 0x114   : > { %v2077_v44 = vmul.f32 -1.442695, %v1081_v42  ;;  %v1082_v45 = vadd.f32 %v1078_v41, %v996_v43 }
 0x116   : > { %2423 = vpow2.f32 %v2077_v44  ;;  %v2078_v47 = vmul.f32 -1.442695, %v1082_v45 }
 0x118   : > { %2425 = vpow2.f32 %v2078_v47 }
 0x119   : > { %v2197_v49 = vpop.f32.mrb[4].mxu1 }
 0x11a   : > { %v2198_v50 = vpop.f32.mrb[5].mxu1  ;;  %v1355_v51 = vpop.f32.mrb[4].mxu0 }
 0x11b   : > { %v2199_v53 = vadd.f32 %v2198_v50, %v2197_v49  ;;  %v2200_v54 = vpop.f32.mrb[6].mxu1  ;;  %v2276_v55 = vpop.f32.mrb[5].mxu0  ;;  %v1356_v0 = vadd.f32 %v2097_v57, %v1355_v51 }
 0x11c   : > { %v2201_v58 = vpop.f32.mrb[7].mxu1  ;;  %v1358_v59 = vpop.f32.mrb[6].mxu0 }
 0x11d   : > { %v1267_v60 = vadd.f32 %v2199_v53, %v1134_v48  ;;  %v2202_v61 = vadd.f32 %v2201_v58, %v2200_v54  ;;  %v2277_v62 = vpop.f32.mrb[7].mxu0  ;;  %v1359_v7 = vadd.f32 %v2097_v57, %v1358_v59  ;;  %v2417_v59 = vld [vmem:[%s2980_s22] sm:$0xff]  }
 0x11e   : > { %v2420_v62 = vld [vmem:[%s2980_s22 + $0x18] sm:$0xff]  }
 0x11f   : > { %v1280_v63 = vadd.f32 %v2096_v56, %v1267_v60  ;;  %v1270_v2 = vadd.f32 %v2202_v61, %v1135_v52  ;;  %v2418_v60 = vld [vmem:[%s2980_s22 + $0x8] sm:$0xff]   ;;  %v2419_v61 = vld [vmem:[%s2980_s22 + $0x10] sm:$0xff]  }
 0x120   : > { %v2424_v3 = vpop.eup %2423 }
 0x121   : > { %v1089_v4 = vadd.f32 1.0, %v2424_v3  ;;  %v1362_v5 = vadd.f32 %v1356_v0, %v1280_v63  ;;  %v1281_v6 = vadd.f32 %v2096_v56, %v1270_v2  ;;  %v2129_v63 = vld [vmem:[%s2977_s19] ss:$0 sm:$0xff] }
 0x122   : > { %v2426_v8 = vpop.eup %2425 }
 0x123   : > { %2427 = vrcp.f32 %v1089_v4  ;;  %v1090_v9 = vadd.f32 1.0, %v2426_v8  ;;  %v1363_v10 = vadd.f32 %v1359_v7, %v1281_v6  ;;  %v2103_v15 = vmul.f32 -1.442695, %v1362_v5 }
 0x125   : > { %2429 = vrcp.f32 %v1090_v9  ;;  %v2104_v22 = vmul.f32 -1.442695, %v1363_v10  ;;  %v2421_v10 = vld [vmem:[%s2980_s22 + $0x20] sm:$0xff]  }
 0x126   : > { %2431 = vpow2.f32 %v2103_v15 }
 0x127   : > { %2433 = vpow2.f32 %v2104_v22 }
 0x129   : > { %v1636_v12 = vpop.f32.mrb[8].mxu1 }
 0x12a   : > { %v1637_v13 = vadd.f32 %v2123_v11, %v1636_v12  ;;  %v2288_v14 = vpop.f32.mrb[9].mxu1  ;;  %v2135_v12 = vld [vmem:[%s2979_s21] ss:$0 sm:$0xff] }
 0x12b   : > { %v1639_v18 = vpop.f32.mrb[10].mxu1 }
 0x12c   : > { %v1640_v19 = vadd.f32 %v2123_v11, %v1639_v18  ;;  %v2289_v20 = vpop.f32.mrb[11].mxu1  ;;  %v2422_v11 = vld [vmem:[%s2980_s22 + $0x28] sm:$0xff]  }
 0x12d   : > { %v2428_v21 = vpop.eup %2427 }
 0x12e   : > { %v1643_v23 = vmul.f32 %v2428_v21, %v1637_v13 }
 0x12f   : > { %v2430_v25 = vpop.eup %2429 }
 0x130   : > { %v1644_v27 = vmul.f32 %v2430_v25, %v1640_v19  ;;  %v2432_v28 = vpop.eup %2431 }
 0x131   : > { %v2434_v31 = vpop.eup %2433  ;;  %v1370_v34 = vadd.f32 1.0, %v2432_v28 }
 0x132   : > { %v1371_v40 = vadd.f32 1.0, %v2434_v31 }
 0x133   : > { %2435 = vrcp.f32 %v1370_v34 }
 0x134   : > { %2437 = vrcp.f32 %v1371_v40 }
 0x13a   : > { %v2224_v30 = vpop.f32.mrb[8].mxu0 }
 0x13b   : > { %v2225_v32 = vpop.f32.mrb[9].mxu0 }
 0x13c   : > { %v2226_v35 = vadd.f32 %v2225_v32, %v2224_v30  ;;  %v2227_v36 = vpop.f32.mrb[10].mxu0 }
 0x13d   : > { %v2228_v38 = vpop.f32.mrb[11].mxu0  ;;  %v2436_v47 = vpop.eup %2435 }
 0x13e   : > { %v1548_v41 = vadd.f32 %v2226_v35, %v1415_v33  ;;  %v2229_v42 = vadd.f32 %v2228_v38, %v2227_v36  ;;  %v2438_v48 = vpop.eup %2437  ;;  %v1649_v49 = vsub.f32 1.0, %v2436_v47  ;;  %v1653_v26 = vmul.f32 %v2436_v47, %v2645_v16  ;;  %v2415_v16 = vld [vmem:[%s2978_s20 + $0x20] sm:$0xff]  }
 0x13f   : > { %v1650_v51 = vsub.f32 1.0, %v2438_v48  ;;  %v1654_v55 = vmul.f32 %v2438_v48, %v2647_v17  ;;  %2311 = vmatpush3.bf16.msra.mxu0 %v2415_v16  ;;  %v2416_v17 = vld [vmem:[%s2978_s20 + $0x28] sm:$0xff]  }
 0x140   : > { %v1561_v43 = vadd.f32 %v2122_v37, %v1548_v41  ;;  %v1551_v44 = vadd.f32 %v2229_v42, %v1416_v39  ;;  %2312 = vmatprep.subr.bf16.mxu0 %v2451_v1 }
 0x142   : > { %v1645_v45 = vadd.f32 %v1643_v23, %v1561_v43  ;;  %v1562_v24 = vadd.f32 %v2122_v37, %v1551_v44 }
 0x143   : > { %2313 = vmatpush3.bf16.msra.mxu0 %v2416_v17 }
 0x144   : > { %2439 = vtanh.f32 %v1645_v45  ;;  %v1646_v46 = vadd.f32 %v1644_v27, %v1562_v24 }
 0x146   : > { %2441 = vtanh.f32 %v1646_v46 }
 0x14e   : > { %v2440_v50 = vpop.eup %2439 }
 0x14f   : > { %v1651_v52 = vmul.f32 %v2440_v50, %v1649_v49 }
 0x150   : > { %v2442_v53 = vpop.eup %2441 }
 0x151   : > { %v1652_v54 = vmul.f32 %v2442_v53, %v1650_v51  ;;  %v1655_v56 = vadd.f32 %v1653_v26, %v1651_v52 }
 0x153   : > { %v1656_v57 = vadd.f32 %v1654_v55, %v1652_v54  ;;  %1946 = vst.msk [vmem:[%s2902_s0] sm:$0xff] %vm1036_vm1, %v1655_v56 }
 0x155   : > { %v1657_v58 = vpack.c.bf16 %v1656_v57, %v1655_v56  ;;  %1947 = vst.msk [vmem:[%s2902_s0 + $0x8] sm:$0xff] %vm1036_vm1, %v1656_v57 }
 0x157   : > { %2299 = vmatmul.mubr.msk.bf16.vlgmr.msra.gmra.mrb[12].mxu1 %vm1036_vm1, %v1657_v58 }
 0x158   : > { %2330 = vmatprep.mubr.msk.bf16.mxu1 %vm2452_vm0, %v2451_v1  ;;  %2319 = vmatpush3.bf16.msra.mxu1 %v2417_v59 }
 0x159   : > { %2320 = vmatprep.subr.bf16.mxu1 %v2451_v1 }
 0x15c   : > { %2321 = vmatpush3.bf16.msra.mxu1 %v2418_v60 }
 0x15d   : > { %2322 = vmatprep.subr.bf16.mxu1 %v2451_v1 }
 0x160   : > { %2323 = vmatpush3.bf16.msra.mxu1 %v2419_v61 }
 0x161   : > { %2324 = vmatprep.subr.bf16.mxu1 %v2451_v1 }
 0x164   : > { %2325 = vmatpush3.bf16.msra.mxu1 %v2420_v62 }
 0x165   : > { %2326 = vmatprep.subr.bf16.mxu1 %v2451_v1 }
 0x168   : > { %2327 = vmatpush3.bf16.msra.mxu1 %v2421_v10 }
 0x169   : > { %2328 = vmatprep.subr.bf16.mxu1 %v2451_v1  ;;  %v2143_v1 = vld [vmem:[%s2981_s23] ss:$0 sm:$0xff] }
 0x16c   : > { %2329 = vmatpush3.bf16.msra.mxu1 %v2422_v11 }
 0x22a   : > { %v1734_v0 = vpop.f32.mrb[12].mxu1 }
 0x22b   : > { %v1735_v2 = vadd.f32 %v2129_v63, %v1734_v0  ;;  %v2300_v3 = vpop.f32.mrb[13].mxu1 }
 0x22c   : > { %v1737_v4 = vpop.f32.mrb[14].mxu1 }
 0x22d   : > { %v1738_v5 = vadd.f32 %v2129_v63, %v1737_v4  ;;  %v2301_v6 = vpop.f32.mrb[15].mxu1  ;;  %v1741_v7 = vmax.f32 %v1735_v2, 0.0 }
 0x22f   : > { %v1742_v8 = vmax.f32 %v1738_v5, 0.0 }
 0x231   : > { %v1743_v9 = vpack.c.bf16 %v1742_v8, %v1741_v7 }
 0x233   : > { %2315 = vmatmul.mubr.msk.bf16.vlgmr.msra.gmra.mrb[12].mxu0 %vm1799_vm2, %v1743_v9 }
 0x306   : > { %v1837_v13 = vpop.f32.mrb[12].mxu0 }
 0x307   : > { %v1838_v14 = vadd.f32 %v2135_v12, %v1837_v13  ;;  %v2316_v15 = vpop.f32.mrb[13].mxu0 }
 0x308   : > { %v1840_v18 = vpop.f32.mrb[14].mxu0 }
 0x309   : > { %v1841_v19 = vadd.f32 %v2135_v12, %v1840_v18  ;;  %v2317_v20 = vpop.f32.mrb[15].mxu0  ;;  %v1844_v21 = vmax.f32 %v1838_v14, 0.0 }
 0x30b   : > { %v1845_v22 = vmax.f32 %v1841_v19, 0.0 }
 0x30d   : > { %v1846_v23 = vpack.c.bf16 %v1845_v22, %v1844_v21 }
 0x30f   : > { %2331 = vmatmul.mubr.msk.bf16.vlgmr.msra.gmra.mrb[16].mxu1 %vm1799_vm2, %v1846_v23 }
 0x3e2   : > { %v1939_v25 = vpop.f32.mrb[16].mxu1 }
 0x3e3   : > { %v1940_v27 = vadd.f32 %v2143_v1, %v1939_v25  ;;  %v2332_v28 = vpop.f32.mrb[17].mxu1 }
 0x3e4   : > { %v1942_v29 = vpop.f32.mrb[18].mxu1 }
 0x3e5   : > { %1950 = vrot.lane.b32.xlu1 %v1940_v27, %s2454_s30  ;;  %v2333_v30 = vpop.f32.mrb[19].mxu1  ;;  %v1943_v31 = vadd.f32 %v2143_v1, %v1942_v29 }
 0x3e9   : > { %1952 = vrot.lane.b32.xlu1 %v1943_v31, %s2454_s30 }
 0x457   : > { %v1951_v32 = vpop.permute.xlu1 %1950 }
 0x458   : > { %1957 = vst.msk [vmem:[%s2902_s0] sm:$0xff] %vm1956_vm3, %v1951_v32 }
 0x45b   : > { %v1953_v33 = vpop.permute.xlu1 %1952 }
 0x45c   : > { %1958 = vst.msk [vmem:[%s2902_s0 + $0x8] sm:$0xff] %vm1956_vm3, %v1953_v33 }
 0x45d PF: > { %s3008_s29 = sld [smem:[#allocation2_spill]] }
 0x463   : > { %s34_s5 = sadd.s32 1, %s3008_s29  }
 0x464   : > { %p31_p4 = scmp.ge.s32.totalorder %s34_s5, 4  }
 0x466   :  { %33 = sbr.rel (!%p31_p4) target bundleno = 11 (0xb), region = 152 }

</bundles_post_ra>
